<compile_context>
chip_gen: v7x
topology: tpu7x:2x2x1
jax: 0.10.0
libtpu: 0.0.40
codegen_flags: <defaults>
</compile_context>

<pallas_src>
import functools

import jax
import jax.numpy as jnp
from jax.experimental import pallas as pl
from jax.experimental.pallas import tpu as pltpu

NN = 100        # logical hidden width of the PyTorch module
NN_PAD = 128    # lane-aligned hidden width used inside the kernel
OUT = 2         # logical output width
OUT_PAD = 128   # lane-aligned output width used inside the kernel
N_HIDDEN = 5    # number of Linear(NN, NN) layers in the Sequential

# Feature fallback bookkeeping (filled in by net_forward).
_DISABLED = set()
_ACTIVE_CONFIG = {"bf16_eltwise": False, "single_buffer_weights": False}


# ----------------------------------------------------------------------------
# Kernel
# ----------------------------------------------------------------------------
def _make_kernel(bf16_eltwise):
    act_dtype = jnp.bfloat16 if bf16_eltwise else jnp.float32

    def _net_kernel(x_ref, w1_ref, b1_ref, wh_ref, bh_ref, w7_ref, b7_ref,
                    out_ref):
        # Layer 1: Linear(1, NN).  K=1 matmul is an outer product -> VPU
        # broadcast multiply, no MXU pass: (TM,1)*(1,128)+(1,128) -> (TM,128).
        pre = x_ref[...] * w1_ref[...] + b1_ref[...]          # f32
        h = jnp.tanh(pre.astype(act_dtype))                   # bf16 tanh on v6e/v7x

        # 5 hidden Linear(128,128) + Tanh layers (statically unrolled).
        # MXU operands bf16, f32 accumulation.  On v6e/v7x the bias-add result
        # is cast to bf16 before tanh (EUP is the saturating slot) and h stays
        # bf16 between layers; on v5e everything elementwise stays f32.
        for l in range(N_HIDDEN):
            lhs = h if bf16_eltwise else h.astype(jnp.bfloat16)
            acc = jnp.dot(lhs, wh_ref[l], preferred_element_type=jnp.float32)
            h = jnp.tanh((acc + bh_ref[l]).astype(act_dtype))

        # Final Linear(NN, 2), zero-padded to 128 output lanes so the store is
        # a lane-dense unmasked vst; the wrapper slices the real 2 columns out.
        lhs = h if bf16_eltwise else h.astype(jnp.bfloat16)
        out = jnp.dot(lhs, w7_ref[...],
                      preferred_element_type=jnp.float32) + b7_ref[...]
        out_ref[...] = out.astype(out_ref.dtype)

    return _net_kernel


# ----------------------------------------------------------------------------
# Parameter init / packing
# ----------------------------------------------------------------------------
def init_params(key):
    """Deterministic init mirroring nn.Linear (weights pre-transposed to (in, out))."""
    dims = [(1, NN)] + [(NN, NN)] * N_HIDDEN + [(NN, OUT)]
    params = []
    for (fan_in, fan_out) in dims:
        key, kw, kb = jax.random.split(key, 3)
        bound = 1.0 / (fan_in ** 0.5)  # PyTorch default uniform bound
        w = jax.random.uniform(kw, (fan_in, fan_out), jnp.float32, -bound, bound)
        b = jax.random.uniform(kb, (1, fan_out), jnp.float32, -bound, bound)
        params.append((w, b))
    return params


def prepare_params(params):
    """Zero-pad 100->128 (and 2->128 on the output), stack the 5 hidden layers,
    and cast the MXU operands to bf16.  Zero padding is numerically exact."""
    (w1, b1), *hidden, (w7, b7) = params
    assert len(hidden) == N_HIDDEN

    w1p = jnp.zeros((1, NN_PAD), jnp.float32).at[:, :NN].set(w1.reshape(1, NN))
    b1p = jnp.zeros((1, NN_PAD), jnp.float32).at[:, :NN].set(b1.reshape(1, NN))

    whp = jnp.zeros((N_HIDDEN, NN_PAD, NN_PAD), jnp.float32)
    bhp = jnp.zeros((N_HIDDEN, 1, NN_PAD), jnp.float32)
    for l, (w, b) in enumerate(hidden):
        whp = whp.at[l, :NN, :NN].set(w)
        bhp = bhp.at[l, 0, :NN].set(b.reshape(NN))
    whp = whp.astype(jnp.bfloat16)

    w7p = jnp.zeros((NN_PAD, OUT_PAD), jnp.float32).at[:NN, :OUT].set(w7)
    w7p = w7p.astype(jnp.bfloat16)
    b7p = jnp.zeros((1, OUT_PAD), jnp.float32).at[:, :OUT].set(b7.reshape(1, OUT))

    return w1p, b1p, whp, bhp, w7p, b7p


# ----------------------------------------------------------------------------
# pallas_call wrapper
# ----------------------------------------------------------------------------
@functools.partial(
    jax.jit,
    static_argnames=("block_rows", "bf16_eltwise", "single_buffer_weights"))
def _net_forward_padded(x, prepared, *, block_rows, bf16_eltwise,
                        single_buffer_weights):
    """x: (B_pad, 1) f32 with B_pad % block_rows == 0.  Returns (B_pad, OUT_PAD)."""
    w1p, b1p, whp, bhp, w7p, b7p = prepared
    B_pad = x.shape[0]
    TM = block_rows
    assert B_pad % TM == 0 and TM % 8 == 0

    # Constant index_maps keep the weights VMEM-resident across batch tiles;
    # Buffered(1) (when supported) avoids allocating a pointless second buffer.
    wkw = dict(pipeline_mode=pl.Buffered(1)) if single_buffer_weights else {}

    in_specs = [
        pl.BlockSpec((TM, 1), lambda i: (i, 0)),                            # x tile
        pl.BlockSpec((1, NN_PAD), lambda i: (0, 0), **wkw),                 # w1
        pl.BlockSpec((1, NN_PAD), lambda i: (0, 0), **wkw),                 # b1
        pl.BlockSpec((N_HIDDEN, NN_PAD, NN_PAD), lambda i: (0, 0, 0), **wkw),  # hidden W
        pl.BlockSpec((N_HIDDEN, 1, NN_PAD), lambda i: (0, 0, 0), **wkw),    # hidden b
        pl.BlockSpec((NN_PAD, OUT_PAD), lambda i: (0, 0), **wkw),           # w7 (padded)
        pl.BlockSpec((1, OUT_PAD), lambda i: (0, 0), **wkw),                # b7 (padded)
    ]

    return pl.pallas_call(
        _make_kernel(bf16_eltwise),
        out_shape=jax.ShapeDtypeStruct((B_pad, OUT_PAD), jnp.float32),
        grid=(B_pad // TM,),
        in_specs=in_specs,
        out_specs=pl.BlockSpec((TM, OUT_PAD), lambda i: (i, 0)),
        compiler_params=pltpu.CompilerParams(
            dimension_semantics=("parallel",)),
    )(x, w1p, b1p, whp, bhp, w7p, b7p)


def _tpu_supports_bf16_eltwise():
    """True for v6e / v7x (bf16 VPU+EUP); False for v5e and older / unknown."""
    try:
        kind = jax.devices()[0].device_kind.lower()
    except Exception:
        return False
    return any(tag in kind for tag in ("v6", "v7", "7x"))


def _pick_block_rows(batch):
    """Large tiles amortize the ~0.35us per-grid-step overhead and feed the
    MXU a longer M, but keep >= 2 batch tiles so the 'parallel' axis can shard
    across v7x's two TensorCores.  Tiny batches stay at TM=128."""
    for tm in (1024, 512, 256):
        if batch >= 2 * tm:
            return tm
    return 128


def net_forward(x, prepared, *, block_rows=None):
    """x: (B, 1) float32.  prepared: output of prepare_params.  Returns (B, 2)."""
    B = x.shape[0]
    TM = block_rows if block_rows is not None else _pick_block_rows(B)
    B_pad = ((B + TM - 1) // TM) * TM
    if B_pad != B:
        x = jnp.pad(x, ((0, B_pad - B), (0, 0)))

    want_bf16 = _tpu_supports_bf16_eltwise() and "bf16_eltwise" not in _DISABLED
    want_sbuf = hasattr(pl, "Buffered") and "single_buffer_weights" not in _DISABLED

    # Preferred config first; gracefully fall back if this Pallas/Mosaic build
    # rejects bf16 elementwise lowering or pipeline_mode=Buffered(1).
    candidates = []
    for bf16 in ([True, False] if want_bf16 else [False]):
        for sbuf in ([True, False] if want_sbuf else [False]):
            candidates.append((bf16, sbuf))

    last_err = None
    for bf16, sbuf in candidates:
        try:
            out_padded = _net_forward_padded(
                x, prepared, block_rows=TM, bf16_eltwise=bf16,
                single_buffer_weights=sbuf)
        except Exception as e:  # noqa: BLE001 - feature probing fallback
            last_err = e
            continue
        _ACTIVE_CONFIG["bf16_eltwise"] = bf16
        _ACTIVE_CONFIG["single_buffer_weights"] = sbuf
        if want_bf16 and not bf16:
            _DISABLED.add("bf16_eltwise")
        if want_sbuf and not sbuf:
            _DISABLED.add("single_buffer_weights")
        return out_padded[:B, :OUT]
    raise last_err


def net_forward_ref(x, prepared, *, bf16_eltwise=False):
    """Pure-JAX reference mirroring the kernel's math (same padding / dtypes)."""
    w1p, b1p, whp, bhp, w7p, b7p = prepared
    act = jnp.bfloat16 if bf16_eltwise else jnp.float32
    h = jnp.tanh((x * w1p + b1p).astype(act))
    for l in range(N_HIDDEN):
        lhs = h if bf16_eltwise else h.astype(jnp.bfloat16)
        acc = jnp.dot(lhs, whp[l], preferred_element_type=jnp.float32)
        h = jnp.tanh((acc + bhp[l]).astype(act))
    lhs = h if bf16_eltwise else h.astype(jnp.bfloat16)
    out = jnp.dot(lhs, w7p, preferred_element_type=jnp.float32) + b7p
    return out[:, :OUT]


if __name__ == "__main__":
    key = jax.random.PRNGKey(0)
    k_in, k_p = jax.random.split(key)

    B = 256  # small batch; auto-picks TM=128 -> 2 grid tiles (both v7x TCs)
    x = jax.random.uniform(k_in, (B, 1), jnp.float32, -2.0, 2.0)
    params = init_params(k_p)
    prepared = prepare_params(params)

    out = net_forward(x, prepared)
    out = jax.block_until_ready(out)
    assert out.shape == (B, OUT)

    ref = net_forward_ref(x, prepared,
                          bf16_eltwise=_ACTIVE_CONFIG["bf16_eltwise"])
    max_err = float(jnp.max(jnp.abs(out - ref)))
    assert jnp.allclose(out, ref, atol=2e-2, rtol=2e-2), max_err

    print("KERNEL_OK")
</pallas_src>

<mosaic_0001>
module attributes {stable_mosaic.version = 11 : i64} {
  func.func @_net_kernel(%arg0: i32, %arg1: memref<128x1xf32, #tpu.memory_space<vmem>>, %arg2: memref<1x128xf32, #tpu.memory_space<vmem>>, %arg3: memref<1x128xf32, #tpu.memory_space<vmem>>, %arg4: memref<5x128x128xbf16, #tpu.memory_space<vmem>>, %arg5: memref<5x1x128xf32, #tpu.memory_space<vmem>>, %arg6: memref<128x128xbf16, #tpu.memory_space<vmem>>, %arg7: memref<1x128xf32, #tpu.memory_space<vmem>>, %arg8: memref<128x128xf32, #tpu.memory_space<vmem>>) attributes {dimension_semantics = [#tpu.dimension_semantics<parallel>], iteration_bounds = array<i64: 2>, scalar_prefetch = 0 : i64, scratch_operands = 0 : i64, tpu.core_type = #tpu.core_type<tc>, window_params = [{transform_indices = @transform_0, window_bounds = array<i64: 128, 1>}, {pipeline_mode = #tpu.pipeline_mode<synchronous>, transform_indices = @transform_1, window_bounds = array<i64: 1, 128>}, {pipeline_mode = #tpu.pipeline_mode<synchronous>, transform_indices = @transform_2, window_bounds = array<i64: 1, 128>}, {pipeline_mode = #tpu.pipeline_mode<synchronous>, transform_indices = @transform_3, window_bounds = array<i64: 5, 128, 128>}, {pipeline_mode = #tpu.pipeline_mode<synchronous>, transform_indices = @transform_4, window_bounds = array<i64: 5, 1, 128>}, {pipeline_mode = #tpu.pipeline_mode<synchronous>, transform_indices = @transform_5, window_bounds = array<i64: 128, 128>}, {pipeline_mode = #tpu.pipeline_mode<synchronous>, transform_indices = @transform_6, window_bounds = array<i64: 1, 128>}, {transform_indices = @transform_7, window_bounds = array<i64: 128, 128>}]} {
    %c0 = arith.constant 0 : index
    %c0_0 = arith.constant 0 : index
    %0 = vector.load %arg1[%c0, %c0_0] : memref<128x1xf32, #tpu.memory_space<vmem>>, vector<128x1xf32>
    %c0_1 = arith.constant 0 : index
    %c0_2 = arith.constant 0 : index
    %1 = vector.load %arg2[%c0_1, %c0_2] : memref<1x128xf32, #tpu.memory_space<vmem>>, vector<1x128xf32>
    %2 = vector.broadcast %0 : vector<128x1xf32> to vector<128x128xf32>
    %3 = vector.broadcast %1 : vector<1x128xf32> to vector<128x128xf32>
    %4 = arith.mulf %2, %3 : vector<128x128xf32>
    %c0_3 = arith.constant 0 : index
    %c0_4 = arith.constant 0 : index
    %5 = vector.load %arg3[%c0_3, %c0_4] : memref<1x128xf32, #tpu.memory_space<vmem>>, vector<1x128xf32>
    %6 = vector.broadcast %5 : vector<1x128xf32> to vector<128x128xf32>
    %7 = arith.addf %4, %6 : vector<128x128xf32>
    %8 = math.tanh %7 : vector<128x128xf32>
    %9 = arith.truncf %8 : vector<128x128xf32> to vector<128x128xbf16>
    %c0_5 = arith.constant 0 : index
    %c0_6 = arith.constant 0 : index
    %c0_7 = arith.constant 0 : index
    %10 = vector.load %arg4[%c0_5, %c0_6, %c0_7] : memref<5x128x128xbf16, #tpu.memory_space<vmem>>, vector<1x128x128xbf16>
    %11 = vector.shape_cast %10 : vector<1x128x128xbf16> to vector<128x128xbf16>
    %cst = arith.constant dense<0.000000e+00> : vector<128x128xf32>
    %12 = tpu.matmul %9, %11, %cst {dimension_numbers = #tpu.dot_dimension_numbers<[1], [0], [0], [1], [0, 0, 1, 1], [], []>} : vector<128x128xbf16>, vector<128x128xbf16>, vector<128x128xf32> -> vector<128x128xf32>
    %c0_8 = arith.constant 0 : index
    %c0_9 = arith.constant 0 : index
    %c0_10 = arith.constant 0 : index
    %13 = vector.load %arg5[%c0_8, %c0_9, %c0_10] : memref<5x1x128xf32, #tpu.memory_space<vmem>>, vector<1x1x128xf32>
    %14 = vector.shape_cast %13 : vector<1x1x128xf32> to vector<1x128xf32>
    %15 = vector.broadcast %14 : vector<1x128xf32> to vector<128x128xf32>
    %16 = arith.addf %12, %15 : vector<128x128xf32>
    %17 = math.tanh %16 : vector<128x128xf32>
    %18 = arith.truncf %17 : vector<128x128xf32> to vector<128x128xbf16>
    %c1 = arith.constant 1 : index
    %c0_11 = arith.constant 0 : index
    %c0_12 = arith.constant 0 : index
    %19 = vector.load %arg4[%c1, %c0_11, %c0_12] : memref<5x128x128xbf16, #tpu.memory_space<vmem>>, vector<1x128x128xbf16>
    %20 = vector.shape_cast %19 : vector<1x128x128xbf16> to vector<128x128xbf16>
    %cst_13 = arith.constant dense<0.000000e+00> : vector<128x128xf32>
    %21 = tpu.matmul %18, %20, %cst_13 {dimension_numbers = #tpu.dot_dimension_numbers<[1], [0], [0], [1], [0, 0, 1, 1], [], []>} : vector<128x128xbf16>, vector<128x128xbf16>, vector<128x128xf32> -> vector<128x128xf32>
    %c1_14 = arith.constant 1 : index
    %c0_15 = arith.constant 0 : index
    %c0_16 = arith.constant 0 : index
    %22 = vector.load %arg5[%c1_14, %c0_15, %c0_16] : memref<5x1x128xf32, #tpu.memory_space<vmem>>, vector<1x1x128xf32>
    %23 = vector.shape_cast %22 : vector<1x1x128xf32> to vector<1x128xf32>
    %24 = vector.broadcast %23 : vector<1x128xf32> to vector<128x128xf32>
    %25 = arith.addf %21, %24 : vector<128x128xf32>
    %26 = math.tanh %25 : vector<128x128xf32>
    %27 = arith.truncf %26 : vector<128x128xf32> to vector<128x128xbf16>
    %c2 = arith.constant 2 : index
    %c0_17 = arith.constant 0 : index
    %c0_18 = arith.constant 0 : index
    %28 = vector.load %arg4[%c2, %c0_17, %c0_18] : memref<5x128x128xbf16, #tpu.memory_space<vmem>>, vector<1x128x128xbf16>
    %29 = vector.shape_cast %28 : vector<1x128x128xbf16> to vector<128x128xbf16>
    %cst_19 = arith.constant dense<0.000000e+00> : vector<128x128xf32>
    %30 = tpu.matmul %27, %29, %cst_19 {dimension_numbers = #tpu.dot_dimension_numbers<[1], [0], [0], [1], [0, 0, 1, 1], [], []>} : vector<128x128xbf16>, vector<128x128xbf16>, vector<128x128xf32> -> vector<128x128xf32>
    %c2_20 = arith.constant 2 : index
    %c0_21 = arith.constant 0 : index
    %c0_22 = arith.constant 0 : index
    %31 = vector.load %arg5[%c2_20, %c0_21, %c0_22] : memref<5x1x128xf32, #tpu.memory_space<vmem>>, vector<1x1x128xf32>
    %32 = vector.shape_cast %31 : vector<1x1x128xf32> to vector<1x128xf32>
    %33 = vector.broadcast %32 : vector<1x128xf32> to vector<128x128xf32>
    %34 = arith.addf %30, %33 : vector<128x128xf32>
    %35 = math.tanh %34 : vector<128x128xf32>
    %36 = arith.truncf %35 : vector<128x128xf32> to vector<128x128xbf16>
    %c3 = arith.constant 3 : index
    %c0_23 = arith.constant 0 : index
    %c0_24 = arith.constant 0 : index
    %37 = vector.load %arg4[%c3, %c0_23, %c0_24] : memref<5x128x128xbf16, #tpu.memory_space<vmem>>, vector<1x128x128xbf16>
    %38 = vector.shape_cast %37 : vector<1x128x128xbf16> to vector<128x128xbf16>
    %cst_25 = arith.constant dense<0.000000e+00> : vector<128x128xf32>
    %39 = tpu.matmul %36, %38, %cst_25 {dimension_numbers = #tpu.dot_dimension_numbers<[1], [0], [0], [1], [0, 0, 1, 1], [], []>} : vector<128x128xbf16>, vector<128x128xbf16>, vector<128x128xf32> -> vector<128x128xf32>
    %c3_26 = arith.constant 3 : index
    %c0_27 = arith.constant 0 : index
    %c0_28 = arith.constant 0 : index
    %40 = vector.load %arg5[%c3_26, %c0_27, %c0_28] : memref<5x1x128xf32, #tpu.memory_space<vmem>>, vector<1x1x128xf32>
    %41 = vector.shape_cast %40 : vector<1x1x128xf32> to vector<1x128xf32>
    %42 = vector.broadcast %41 : vector<1x128xf32> to vector<128x128xf32>
    %43 = arith.addf %39, %42 : vector<128x128xf32>
    %44 = math.tanh %43 : vector<128x128xf32>
    %45 = arith.truncf %44 : vector<128x128xf32> to vector<128x128xbf16>
    %c4 = arith.constant 4 : index
    %c0_29 = arith.constant 0 : index
    %c0_30 = arith.constant 0 : index
    %46 = vector.load %arg4[%c4, %c0_29, %c0_30] : memref<5x128x128xbf16, #tpu.memory_space<vmem>>, vector<1x128x128xbf16>
    %47 = vector.shape_cast %46 : vector<1x128x128xbf16> to vector<128x128xbf16>
    %cst_31 = arith.constant dense<0.000000e+00> : vector<128x128xf32>
    %48 = tpu.matmul %45, %47, %cst_31 {dimension_numbers = #tpu.dot_dimension_numbers<[1], [0], [0], [1], [0, 0, 1, 1], [], []>} : vector<128x128xbf16>, vector<128x128xbf16>, vector<128x128xf32> -> vector<128x128xf32>
    %c4_32 = arith.constant 4 : index
    %c0_33 = arith.constant 0 : index
    %c0_34 = arith.constant 0 : index
    %49 = vector.load %arg5[%c4_32, %c0_33, %c0_34] : memref<5x1x128xf32, #tpu.memory_space<vmem>>, vector<1x1x128xf32>
    %50 = vector.shape_cast %49 : vector<1x1x128xf32> to vector<1x128xf32>
    %51 = vector.broadcast %50 : vector<1x128xf32> to vector<128x128xf32>
    %52 = arith.addf %48, %51 : vector<128x128xf32>
    %53 = math.tanh %52 : vector<128x128xf32>
    %54 = arith.truncf %53 : vector<128x128xf32> to vector<128x128xbf16>
    %c0_35 = arith.constant 0 : index
    %c0_36 = arith.constant 0 : index
    %55 = vector.load %arg6[%c0_35, %c0_36] : memref<128x128xbf16, #tpu.memory_space<vmem>>, vector<128x128xbf16>
    %cst_37 = arith.constant dense<0.000000e+00> : vector<128x128xf32>
    %56 = tpu.matmul %54, %55, %cst_37 {dimension_numbers = #tpu.dot_dimension_numbers<[1], [0], [0], [1], [0, 0, 1, 1], [], []>} : vector<128x128xbf16>, vector<128x128xbf16>, vector<128x128xf32> -> vector<128x128xf32>
    %c0_38 = arith.constant 0 : index
    %c0_39 = arith.constant 0 : index
    %57 = vector.load %arg7[%c0_38, %c0_39] : memref<1x128xf32, #tpu.memory_space<vmem>>, vector<1x128xf32>
    %58 = vector.broadcast %57 : vector<1x128xf32> to vector<128x128xf32>
    %59 = arith.addf %56, %58 : vector<128x128xf32>
    %c0_40 = arith.constant 0 : index
    %c0_41 = arith.constant 0 : index
    %60 = vector.load %arg8[%c0_40, %c0_41] : memref<128x128xf32, #tpu.memory_space<vmem>>, vector<128x128xf32>
    tpu.vector_store %arg8[%c0_40, %c0_41], %59 {strides = array<i32>} : memref<128x128xf32, #tpu.memory_space<vmem>>, vector<128x128xf32>,
    return
  }
  func.func @transform_0(%arg0: i32) -> (i32, i32) {
    %c0_i32 = arith.constant 0 : i32
    %c0_i32_0 = arith.constant 0 : i32
    return %arg0, %c0_i32 : i32, i32
  }
  func.func @transform_1(%arg0: i32) -> (i32, i32) {
    %c0_i32 = arith.constant 0 : i32
    %c0_i32_0 = arith.constant 0 : i32
    %c0_i32_1 = arith.constant 0 : i32
    return %c0_i32, %c0_i32_0 : i32, i32
  }
  func.func @transform_2(%arg0: i32) -> (i32, i32) {
    %c0_i32 = arith.constant 0 : i32
    %c0_i32_0 = arith.constant 0 : i32
    %c0_i32_1 = arith.constant 0 : i32
    return %c0_i32, %c0_i32_0 : i32, i32
  }
  func.func @transform_3(%arg0: i32) -> (i32, i32, i32) {
    %c0_i32 = arith.constant 0 : i32
    %c0_i32_0 = arith.constant 0 : i32
    %c0_i32_1 = arith.constant 0 : i32
    %c0_i32_2 = arith.constant 0 : i32
    return %c0_i32, %c0_i32_0, %c0_i32_1 : i32, i32, i32
  }
  func.func @transform_4(%arg0: i32) -> (i32, i32, i32) {
    %c0_i32 = arith.constant 0 : i32
    %c0_i32_0 = arith.constant 0 : i32
    %c0_i32_1 = arith.constant 0 : i32
    %c0_i32_2 = arith.constant 0 : i32
    return %c0_i32, %c0_i32_0, %c0_i32_1 : i32, i32, i32
  }
  func.func @transform_5(%arg0: i32) -> (i32, i32) {
    %c0_i32 = arith.constant 0 : i32
    %c0_i32_0 = arith.constant 0 : i32
    %c0_i32_1 = arith.constant 0 : i32
    return %c0_i32, %c0_i32_0 : i32, i32
  }
  func.func @transform_6(%arg0: i32) -> (i32, i32) {
    %c0_i32 = arith.constant 0 : i32
    %c0_i32_0 = arith.constant 0 : i32
    %c0_i32_1 = arith.constant 0 : i32
    return %c0_i32, %c0_i32_0 : i32, i32
  }
  func.func @transform_7(%arg0: i32) -> (i32, i32) {
    %c0_i32 = arith.constant 0 : i32
    %c0_i32_0 = arith.constant 0 : i32
    return %arg0, %c0_i32 : i32, i32
  }
}

module attributes {stable_mosaic.version = 11 : i64} {
  func.func @_net_kernel(%arg0: i32, %arg1: memref<128x1xf32, #tpu.memory_space<vmem>>, %arg2: memref<1x128xf32, #tpu.memory_space<vmem>>, %arg3: memref<1x128xf32, #tpu.memory_space<vmem>>, %arg4: memref<5x128x128xbf16, #tpu.memory_space<vmem>>, %arg5: memref<5x1x128xf32, #tpu.memory_space<vmem>>, %arg6: memref<128x128xbf16, #tpu.memory_space<vmem>>, %arg7: memref<1x128xf32, #tpu.memory_space<vmem>>, %arg8: memref<128x128xf32, #tpu.memory_space<vmem>>) attributes {dimension_semantics = [#tpu.dimension_semantics<parallel>], iteration_bounds = array<i64: 2>, scalar_prefetch = 0 : i64, scratch_operands = 0 : i64, tpu.core_type = #tpu.core_type<tc>, window_params = [{transform_indices = @transform_0, window_bounds = array<i64: 128, 1>}, {pipeline_mode = #tpu.pipeline_mode<synchronous>, transform_indices = @transform_1, window_bounds = array<i64: 1, 128>}, {pipeline_mode = #tpu.pipeline_mode<synchronous>, transform_indices = @transform_2, window_bounds = array<i64: 1, 128>}, {pipeline_mode = #tpu.pipeline_mode<synchronous>, transform_indices = @transform_3, window_bounds = array<i64: 5, 128, 128>}, {pipeline_mode = #tpu.pipeline_mode<synchronous>, transform_indices = @transform_4, window_bounds = array<i64: 5, 1, 128>}, {pipeline_mode = #tpu.pipeline_mode<synchronous>, transform_indices = @transform_5, window_bounds = array<i64: 128, 128>}, {pipeline_mode = #tpu.pipeline_mode<synchronous>, transform_indices = @transform_6, window_bounds = array<i64: 1, 128>}, {transform_indices = @transform_7, window_bounds = array<i64: 128, 128>}]} {
    %c0 = arith.constant 0 : index
    %c0_0 = arith.constant 0 : index
    %0 = vector.load %arg1[%c0, %c0_0] : memref<128x1xf32, #tpu.memory_space<vmem>>, vector<128x1xf32>
    %c0_1 = arith.constant 0 : index
    %c0_2 = arith.constant 0 : index
    %1 = vector.load %arg2[%c0_1, %c0_2] : memref<1x128xf32, #tpu.memory_space<vmem>>, vector<1x128xf32>
    %2 = vector.broadcast %0 : vector<128x1xf32> to vector<128x128xf32>
    %3 = vector.broadcast %1 : vector<1x128xf32> to vector<128x128xf32>
    %4 = arith.mulf %2, %3 : vector<128x128xf32>
    %c0_3 = arith.constant 0 : index
    %c0_4 = arith.constant 0 : index
    %5 = vector.load %arg3[%c0_3, %c0_4] : memref<1x128xf32, #tpu.memory_space<vmem>>, vector<1x128xf32>
    %6 = vector.broadcast %5 : vector<1x128xf32> to vector<128x128xf32>
    %7 = arith.addf %4, %6 : vector<128x128xf32>
    %8 = math.tanh %7 : vector<128x128xf32>
    %9 = arith.truncf %8 : vector<128x128xf32> to vector<128x128xbf16>
    %c0_5 = arith.constant 0 : index
    %c0_6 = arith.constant 0 : index
    %c0_7 = arith.constant 0 : index
    %10 = vector.load %arg4[%c0_5, %c0_6, %c0_7] : memref<5x128x128xbf16, #tpu.memory_space<vmem>>, vector<1x128x128xbf16>
    %11 = vector.shape_cast %10 : vector<1x128x128xbf16> to vector<128x128xbf16>
    %cst = arith.constant dense<0.000000e+00> : vector<128x128xf32>
    %12 = tpu.matmul %9, %11, %cst {dimension_numbers = #tpu.dot_dimension_numbers<[1], [0], [0], [1], [0, 0, 1, 1], [], []>} : vector<128x128xbf16>, vector<128x128xbf16>, vector<128x128xf32> -> vector<128x128xf32>
    %c0_8 = arith.constant 0 : index
    %c0_9 = arith.constant 0 : index
    %c0_10 = arith.constant 0 : index
    %13 = vector.load %arg5[%c0_8, %c0_9, %c0_10] : memref<5x1x128xf32, #tpu.memory_space<vmem>>, vector<1x1x128xf32>
    %14 = vector.shape_cast %13 : vector<1x1x128xf32> to vector<1x128xf32>
    %15 = vector.broadcast %14 : vector<1x128xf32> to vector<128x128xf32>
    %16 = arith.addf %12, %15 : vector<128x128xf32>
    %17 = math.tanh %16 : vector<128x128xf32>
    %18 = arith.truncf %17 : vector<128x128xf32> to vector<128x128xbf16>
    %c1 = arith.constant 1 : index
    %c0_11 = arith.constant 0 : index
    %c0_12 = arith.constant 0 : index
    %19 = vector.load %arg4[%c1, %c0_11, %c0_12] : memref<5x128x128xbf16, #tpu.memory_space<vmem>>, vector<1x128x128xbf16>
    %20 = vector.shape_cast %19 : vector<1x128x128xbf16> to vector<128x128xbf16>
    %cst_13 = arith.constant dense<0.000000e+00> : vector<128x128xf32>
    %21 = tpu.matmul %18, %20, %cst_13 {dimension_numbers = #tpu.dot_dimension_numbers<[1], [0], [0], [1], [0, 0, 1, 1], [], []>} : vector<128x128xbf16>, vector<128x128xbf16>, vector<128x128xf32> -> vector<128x128xf32>
    %c1_14 = arith.constant 1 : index
    %c0_15 = arith.constant 0 : index
    %c0_16 = arith.constant 0 : index
    %22 = vector.load %arg5[%c1_14, %c0_15, %c0_16] : memref<5x1x128xf32, #tpu.memory_space<vmem>>, vector<1x1x128xf32>
    %23 = vector.shape_cast %22 : vector<1x1x128xf32> to vector<1x128xf32>
    %24 = vector.broadcast %23 : vector<1x128xf32> to vector<128x128xf32>
    %25 = arith.addf %21, %24 : vector<128x128xf32>
    %26 = math.tanh %25 : vector<128x128xf32>
    %27 = arith.truncf %26 : vector<128x128xf32> to vector<128x128xbf16>
    %c2 = arith.constant 2 : index
    %c0_17 = arith.constant 0 : index
    %c0_18 = arith.constant 0 : index
    %28 = vector.load %arg4[%c2, %c0_17, %c0_18] : memref<5x128x128xbf16, #tpu.memory_space<vmem>>, vector<1x128x128xbf16>
    %29 = vector.shape_cast %28 : vector<1x128x128xbf16> to vector<128x128xbf16>
    %cst_19 = arith.constant dense<0.000000e+00> : vector<128x128xf32>
    %30 = tpu.matmul %27, %29, %cst_19 {dimension_numbers = #tpu.dot_dimension_numbers<[1], [0], [0], [1], [0, 0, 1, 1], [], []>} : vector<128x128xbf16>, vector<128x128xbf16>, vector<128x128xf32> -> vector<128x128xf32>
    %c2_20 = arith.constant 2 : index
    %c0_21 = arith.constant 0 : index
    %c0_22 = arith.constant 0 : index
    %31 = vector.load %arg5[%c2_20, %c0_21, %c0_22] : memref<5x1x128xf32, #tpu.memory_space<vmem>>, vector<1x1x128xf32>
    %32 = vector.shape_cast %31 : vector<1x1x128xf32> to vector<1x128xf32>
    %33 = vector.broadcast %32 : vector<1x128xf32> to vector<128x128xf32>
    %34 = arith.addf %30, %33 : vector<128x128xf32>
    %35 = math.tanh %34 : vector<128x128xf32>
    %36 = arith.truncf %35 : vector<128x128xf32> to vector<128x128xbf16>
    %c3 = arith.constant 3 : index
    %c0_23 = arith.constant 0 : index
    %c0_24 = arith.constant 0 : index
    %37 = vector.load %arg4[%c3, %c0_23, %c0_24] : memref<5x128x128xbf16, #tpu.memory_space<vmem>>, vector<1x128x128xbf16>
    %38 = vector.shape_cast %37 : vector<1x128x128xbf16> to vector<128x128xbf16>
    %cst_25 = arith.constant dense<0.000000e+00> : vector<128x128xf32>
    %39 = tpu.matmul %36, %38, %cst_25 {dimension_numbers = #tpu.dot_dimension_numbers<[1], [0], [0], [1], [0, 0, 1, 1], [], []>} : vector<128x128xbf16>, vector<128x128xbf16>, vector<128x128xf32> -> vector<128x128xf32>
    %c3_26 = arith.constant 3 : index
    %c0_27 = arith.constant 0 : index
    %c0_28 = arith.constant 0 : index
    %40 = vector.load %arg5[%c3_26, %c0_27, %c0_28] : memref<5x1x128xf32, #tpu.memory_space<vmem>>, vector<1x1x128xf32>
    %41 = vector.shape_cast %40 : vector<1x1x128xf32> to vector<1x128xf32>
    %42 = vector.broadcast %41 : vector<1x128xf32> to vector<128x128xf32>
    %43 = arith.addf %39, %42 : vector<128x128xf32>
    %44 = math.tanh %43 : vector<128x128xf32>
    %45 = arith.truncf %44 : vector<128x128xf32> to vector<128x128xbf16>
    %c4 = arith.constant 4 : index
    %c0_29 = arith.constant 0 : index
    %c0_30 = arith.constant 0 : index
    %46 = vector.load %arg4[%c4, %c0_29, %c0_30] : memref<5x128x128xbf16, #tpu.memory_space<vmem>>, vector<1x128x128xbf16>
    %47 = vector.shape_cast %46 : vector<1x128x128xbf16> to vector<128x128xbf16>
    %cst_31 = arith.constant dense<0.000000e+00> : vector<128x128xf32>
    %48 = tpu.matmul %45, %47, %cst_31 {dimension_numbers = #tpu.dot_dimension_numbers<[1], [0], [0], [1], [0, 0, 1, 1], [], []>} : vector<128x128xbf16>, vector<128x128xbf16>, vector<128x128xf32> -> vector<128x128xf32>
    %c4_32 = arith.constant 4 : index
    %c0_33 = arith.constant 0 : index
    %c0_34 = arith.constant 0 : index
    %49 = vector.load %arg5[%c4_32, %c0_33, %c0_34] : memref<5x1x128xf32, #tpu.memory_space<vmem>>, vector<1x1x128xf32>
    %50 = vector.shape_cast %49 : vector<1x1x128xf32> to vector<1x128xf32>
    %51 = vector.broadcast %50 : vector<1x128xf32> to vector<128x128xf32>
    %52 = arith.addf %48, %51 : vector<128x128xf32>
    %53 = math.tanh %52 : vector<128x128xf32>
    %54 = arith.truncf %53 : vector<128x128xf32> to vector<128x128xbf16>
    %c0_35 = arith.constant 0 : index
    %c0_36 = arith.constant 0 : index
    %55 = vector.load %arg6[%c0_35, %c0_36] : memref<128x128xbf16, #tpu.memory_space<vmem>>, vector<128x128xbf16>
    %cst_37 = arith.constant dense<0.000000e+00> : vector<128x128xf32>
    %56 = tpu.matmul %54, %55, %cst_37 {dimension_numbers = #tpu.dot_dimension_numbers<[1], [0], [0], [1], [0, 0, 1, 1], [], []>} : vector<128x128xbf16>, vector<128x128xbf16>, vector<128x128xf32> -> vector<128x128xf32>
    %c0_38 = arith.constant 0 : index
    %c0_39 = arith.constant 0 : index
    %57 = vector.load %arg7[%c0_38, %c0_39] : memref<1x128xf32, #tpu.memory_space<vmem>>, vector<1x128xf32>
    %58 = vector.broadcast %57 : vector<1x128xf32> to vector<128x128xf32>
    %59 = arith.addf %56, %58 : vector<128x128xf32>
    %c0_40 = arith.constant 0 : index
    %c0_41 = arith.constant 0 : index
    %60 = vector.load %arg8[%c0_40, %c0_41] : memref<128x128xf32, #tpu.memory_space<vmem>>, vector<128x128xf32>
    tpu.vector_store %arg8[%c0_40, %c0_41], %59 {strides = array<i32>} : memref<128x128xf32, #tpu.memory_space<vmem>>, vector<128x128xf32>,
    return
  }
  func.func @transform_0(%arg0: i32) -> (i32, i32) {
    %c0_i32 = arith.constant 0 : i32
    %c0_i32_0 = arith.constant 0 : i32
    return %arg0, %c0_i32 : i32, i32
  }
  func.func @transform_1(%arg0: i32) -> (i32, i32) {
    %c0_i32 = arith.constant 0 : i32
    %c0_i32_0 = arith.constant 0 : i32
    %c0_i32_1 = arith.constant 0 : i32
    return %c0_i32, %c0_i32_0 : i32, i32
  }
  func.func @transform_2(%arg0: i32) -> (i32, i32) {
    %c0_i32 = arith.constant 0 : i32
    %c0_i32_0 = arith.constant 0 : i32
    %c0_i32_1 = arith.constant 0 : i32
    return %c0_i32, %c0_i32_0 : i32, i32
  }
  func.func @transform_3(%arg0: i32) -> (i32, i32, i32) {
    %c0_i32 = arith.constant 0 : i32
    %c0_i32_0 = arith.constant 0 : i32
    %c0_i32_1 = arith.constant 0 : i32
    %c0_i32_2 = arith.constant 0 : i32
    return %c0_i32, %c0_i32_0, %c0_i32_1 : i32, i32, i32
  }
  func.func @transform_4(%arg0: i32) -> (i32, i32, i32) {
    %c0_i32 = arith.constant 0 : i32
    %c0_i32_0 = arith.constant 0 : i32
    %c0_i32_1 = arith.constant 0 : i32
    %c0_i32_2 = arith.constant 0 : i32
    return %c0_i32, %c0_i32_0, %c0_i32_1 : i32, i32, i32
  }
  func.func @transform_5(%arg0: i32) -> (i32, i32) {
    %c0_i32 = arith.constant 0 : i32
    %c0_i32_0 = arith.constant 0 : i32
    %c0_i32_1 = arith.constant 0 : i32
    return %c0_i32, %c0_i32_0 : i32, i32
  }
  func.func @transform_6(%arg0: i32) -> (i32, i32) {
    %c0_i32 = arith.constant 0 : i32
    %c0_i32_0 = arith.constant 0 : i32
    %c0_i32_1 = arith.constant 0 : i32
    return %c0_i32, %c0_i32_0 : i32, i32
  }
  func.func @transform_7(%arg0: i32) -> (i32, i32) {
    %c0_i32 = arith.constant 0 : i32
    %c0_i32_0 = arith.constant 0 : i32
    return %arg0, %c0_i32 : i32, i32
  }
}

</mosaic_0001>

<bundles_post_ra>
// kernel: _net_forward_padded.1
= control target key start
LH: loop header
LB: loop body
LE: loop exit
PB: predicated region body
PF: predicated region fallthrough
CT: control target
= control target key end

     0   :  { %12 = vsyncpa [#allocation3], 0  ;;  %s2767_s0 = inlined_call_operand.vmem [shape: f32[256,1], index: 0, kind: input, shape index: {}]   ;;  %s2768_s1 = inlined_call_operand.vmem [shape: f32[1,128], index: 1, kind: input, shape index: {}]   ;;  %s2769_s2 = inlined_call_operand.vmem [shape: f32[1,128], index: 2, kind: input, shape index: {}]   ;;  %s2770_s3 = inlined_call_operand.hbm [shape: bf16[5,128,128], index: 3, kind: input, shape index: {}]   ;;  %s2771_s4 = inlined_call_operand.vmem [shape: f32[5,1,128], index: 4, kind: input, shape index: {}]   ;;  %s2772_s5 = inlined_call_operand.vmem [shape: bf16[128,128], index: 5, kind: input, shape index: {}]   ;;  %s2773_s6 = inlined_call_operand.vmem [shape: f32[1,128], index: 6, kind: input, shape index: {}]   ;;  %s2774_s7 = inlined_call_operand.hbm [shape: f32[256,128], index: 7, kind: output, shape index: {}]  }
   0x1   :  { %13 = vsyncpa [#allocation4], 0 }
   0x2   :  { %15 = vsyncpa [#allocation4 + $0x1], 0  ;;  %s2505_s24 = smov 0   ;;  %s2507_s25 = smov 0  }
   0x3   :  { %s2509_s26 = smov 0   ;;  %s2511_s27 = smov 0  }
   0x4 LB: > { %s2526_s28 = sadd.s32 4294967295, %s2456_s27   ;;  %s1702_s29 = sadd.s32 4294967294, %s2456_s27   ;;  %s2456_s27 = sphi %s2511_s27, %s2790_s27   ;;  %s2452_s26 = sphi %s2509_s26, %s2789_s26   ;;  %s2448_s25 = sphi %s2507_s25, %s2788_s25   ;;  %s2444_s24 = sphi %s2505_s24, %s2787_s24  }
   0x5   : > { %s2530_s30 = sadd.s32 1, %s2456_s27   ;;  %s180_s8 = sadd.s32 1, %s2452_s26 }
   0x6   : > { %s177_s9 = ssub.s32 %s2456_s27, %s2530_s30  ;;  %p190_p0 = scmp.ne.s32.totalorder %s2452_s26, %s2448_s25 }
   0x7   : > { %p178_p1 = scmp.eq.s32.totalorder %s177_s9, 0  ;;  %p191_p2 = scmp.eq.s32.totalorder %s2526_s28, 1 }
   0x8   : > { %p196_p3 = scmp.ne.s32.totalorder %s2448_s25, %s2444_s24  ;;  %p197_p4 = scmp.eq.s32.totalorder %s1702_s29, 1 }
   0x9   : > { %s2541_s10 = scalar_select %p178_p1, %s2452_s26, %s180_s8  }
   0xa   : > { %p2543_p5 = por %p191_p2, %p190_p0  ;;  %p2547_p6 = por %p197_p4, %p196_p3 }
   0xb   : > { %p1703_p7 = scmp.ge.s32.totalorder %s2456_s27, 1  ;;  %p204_p8 = scmp.lt.s32.totalorder %s2456_s27, 3 }
   0xc   : > { %s2778_s11 = scalar_select %p2543_p5, 1, 0 }
   0xd   : > { %s2779_s12 = scalar_select %p2547_p6, 1, 0 }
   0xe   : > { %p2775_p9 = scmp.eq.s32.totalorder %s2526_s28, 0  ;;  %p2554_p10 = pnand %p1703_p7, %p204_p8 }
   0xf   : > { %s2458_s14 = smov [#allocation2]   ;;  %s2362_s19 = scalar_lea.hbm %s2770_s3, 5120 }
  0x10   : > { %s2780_s13 = scalar_select %p2554_p10, 1, 0 }
  0x11   : > { %s222_s15 = sshll.u32 %s2458_s14, 4  ;;  %p2071_p11 = pneg %p2554_p10  ;;  %s223_s15 = int_to_ptr.vmem [resolvable:$true] %s222_s15 }
  0x12   : > { %p2363_p13 = scmp.ne.s32.totalorder %s2770_s3, %s2362_s19  ;;  %p2369_p3 = scmp.lt.u32.totalorder %s2362_s19, %s2770_s3 }
  0x13   : > { %p2562_p12 = pnand %p2775_p9, %p2071_p11 }
  0x15   : > { %p2364_p0 = pneg %p2562_p12 }
  0x17   : > { %p2365_p1 = pnand %p2364_p0, %p2363_p13 }
  0x19   : > { %p2366_p2 = pneg %p2365_p1 }
  0x1b   : > { %p2371_p4 = pnand %p2369_p3, %p2366_p2 }
  0x1d   : > { %2374 = shalt.err (!%p2371_p4)
}
  0x1e   : > { %s2375_s29 = scalar_lea.vmem %s223_s15, 5120  ;;  %p2383_p9 = scmp.lt.s32.totalorder %s223_s15, %s223_s15 }
  0x1f   : > { %p2376_p7 = scmp.ne.s32.totalorder %s223_s15, %s2375_s29  ;;  %p2384_p6 = scmp.lt.s32.totalorder %s2375_s29, %s2375_s29 }
  0x21   : > { %p2378_p8 = pnand %p2376_p7, %p2364_p0  ;;  %p2385_p5 = por %p2384_p6, %p2383_p9 }
  0x23   : > { %p2379_p11 = pneg %p2378_p8 }
  0x25   : > { %p2386_p10 = pnand %p2385_p5, %p2379_p11 }
  0x27   : > { %2389 = shalt.err (!%p2386_p10)
}
  0x28   : > { %s2459_s8 = smov 64   ;;  %s2460_s9 = smov 4  }
  0x29   : > { %2074 = dma.hbm_to_vmem [thread:$0]  (!%p2562_p12), %s2770_s3, 5120, %s223_s15, [#allocation3], %s2459_s8, %s2459_s8, %s2460_s9  }
  0x2a   : > { %p2782_p13 = scmp.ne.s32.totalorder %s2780_s13, 0 }
  0x2b   : > { %p2783_p1 = scmp.eq.s32.totalorder (!%p2782_p13), %s2526_s28, 0 }
  0x2c   : > { %256 = sbr.rel (%p2782_p13) target bundleno = 1621 (0x655), region = 48 }
  0x33   : > { %2435 = dma.done.wait (%p2783_p1), [#allocation3], 5120   ;;  %p2784_p0 = pmov %p2783_p1 }
  0x34   : > { %s1709_s18 = sshll.u32 %s2526_s28, 4  ;;  %v2461_v0 = vmov 0   ;;  %v2122_v7 = vld [vmem:[#allocation2] sm:$0xff]   ;;  %v2123_v8 = vld [vmem:[#allocation2 + $0x8] sm:$0xff]   ;;  %v2124_v11 = vld [vmem:[#allocation2 + $0x10] sm:$0xff]   ;;  %s285_s22 = sand.u32 1, %s2448_s25  }
  0x35   : > { %2437 = vsyncadd (%p2784_p0), [#allocation3], 4294962176  ;;  %2121 = vset.pattern.permute.xlu1 %v2461_v0  ;;  %2120 = vset.pattern.permute.xlu0 %v2461_v0  ;;  %p289_p5 = scmp.lt.s32.totalorder %s1709_s18, 31  ;;  %v2125_v14 = vld [vmem:[#allocation2 + $0x18] sm:$0xff]   ;;  %v2126_v17 = vld [vmem:[#allocation2 + $0x20] sm:$0xff]   ;;  %s1708_s23 = sshll.u32 %s285_s22, 7 }
  0x36   : > { %1873 = vmatprep.subr.bf16.mxu0 %v2122_v7  ;;  %v2127_v20 = vld [vmem:[#allocation2 + $0x28] sm:$0xff]   ;;  %v2128_v23 = vld [vmem:[#allocation2 + $0x30] sm:$0xff]   ;;  %v2129_v24 = vld [vmem:[#allocation2 + $0x38] sm:$0xff]   ;;  %s2697_s9 = scalar_lea.vmem [#allocation5], %s1708_s23  ;;  %s1776_s14 = sshll.u32 %s2526_s28, 11 }
  0x37   : > { %s2792_s18 = smov (!%p289_p5, %s1709_s18), 31  ;;  %1874 = vmatpush3.bf16.msra.mxu0 %v2122_v7  ;;  %v2130_v25 = vld [vmem:[#allocation2 + $0x40] sm:$0xff]   ;;  %v2131_v26 = vld [vmem:[#allocation2 + $0x48] sm:$0xff]   ;;  %v2132_v27 = vld [vmem:[#allocation2 + $0x50] sm:$0xff]   ;;  %s1628_s17 = sshll.u32 %s2697_s9, 4  ;;  %s2719_s17 = int_to_ptr.vmem [resolvable:$true] %s1628_s17 }
  0x38   : > { %s1710_s16 = sshll.u32 %s2792_s18, 3  ;;  %1875 = vmatprep.subr.bf16.mxu0 %v2123_v8  ;;  %1905 = vmatprep.subr.bf16.mxu1 %v2130_v25  ;;  %v2613_v28 = vld [vmem:[%s2768_s1] ss:$0 sm:$0xff]  ;;  %s2717_s19 = scalar_lea.hbm %s2774_s7, %s1776_s14 }
  0x39   : > { %s2592_s15 = scalar_lea.vmem %s2767_s0, %s1710_s16  ;;  %1906 = vmatpush3.bf16.msra.mxu1 %v2130_v25  ;;  %v2618_v29 = vld [vmem:[%s2769_s2] ss:$0 sm:$0xff]  ;;  %s2726_s28 = scalar_lea.sflag [#allocation4], %s285_s22 }
  0x3a   : > { %v298_v1 = vld [vmem:[%s2592_s15 + $0x10] sm:$0xff]  ;;  %v296_v2 = vld [vmem:[%s2592_s15] sm:$0xff]  ;;  %v299_v3 = vld [vmem:[%s2592_s15 + $0x18] sm:$0xff]  ;;  %1907 = vmatprep.subr.bf16.mxu1 %v2131_v26  ;;  %s2390_s20 = scalar_lea.vmem %s2719_s17, 2048  ;;  %p2785_p9 = scmp.ne.s32.totalorder %s2778_s11, 0 }
  0x3b   : > { %325 = vperm.xlu1 %2121, %v298_v1   ;;  %315 = vperm.xlu0 %2120, %v296_v2   ;;  %v297_v4 = vld [vmem:[%s2592_s15 + $0x8] sm:$0xff]  ;;  %v300_v6 = vld [vmem:[%s2592_s15 + $0x20] sm:$0xff]  ;;  %v303_v9 = vld [vmem:[%s2592_s15 + $0x38] sm:$0xff]  ;;  %p2391_p6 = scmp.ne.s32.totalorder %s2719_s17, %s2390_s20 }
  0x3c   : > { %v301_v5 = vld [vmem:[%s2592_s15 + $0x28] sm:$0xff]  ;;  %v302_v10 = vld [vmem:[%s2592_s15 + $0x30] sm:$0xff]  ;;  %v304_v13 = vld [vmem:[%s2592_s15 + $0x40] sm:$0xff]  ;;  %1876 = vmatpush3.bf16.msra.mxu0 %v2123_v8 }
  0x3d   : > { %v305_v12 = vld [vmem:[%s2592_s15 + $0x48] sm:$0xff]  ;;  %1877 = vmatprep.subr.bf16.mxu0 %v2124_v11  ;;  %v307_v15 = vld [vmem:[%s2592_s15 + $0x58] sm:$0xff]  ;;  %v306_v16 = vld [vmem:[%s2592_s15 + $0x50] sm:$0xff]  ;;  %1908 = vmatpush3.bf16.msra.mxu1 %v2131_v26  ;;  %p2392_p10 = pnand %p2391_p6, %p2785_p9 }
  0x3e   : > { %v309_v18 = vld [vmem:[%s2592_s15 + $0x68] sm:$0xff]  ;;  %v308_v19 = vld [vmem:[%s2592_s15 + $0x60] sm:$0xff]  ;;  %v311_v21 = vld [vmem:[%s2592_s15 + $0x78] sm:$0xff]  ;;  %1909 = vmatprep.subr.bf16.mxu1 %v2132_v27 }
  0x3f   : > { %330 = vperm.xlu1 %2121, %v299_v3   ;;  %320 = vperm.xlu0 %2120, %v297_v4   ;;  %v310_v22 = vld [vmem:[%s2592_s15 + $0x70] sm:$0xff]  ;;  %p2393_p12 = pneg %p2392_p10  ;;  %s2462_s15 = smov [#allocation5]  }
  0x40   : > { %1878 = vmatpush3.bf16.msra.mxu0 %v2124_v11  ;;  %s2394_s13 = sshll.u32 %s2462_s15, 4  ;;  %s2395_s13 = int_to_ptr.vmem [resolvable:$false] %s2394_s13 }
  0x41   : > { %1879 = vmatprep.subr.bf16.mxu0 %v2125_v14  ;;  %1910 = vmatpush3.bf16.msra.mxu1 %v2132_v27  ;;  %s2396_s21 = scalar_lea.vmem %s2395_s13, 4096  ;;  %p2397_p2 = scmp.lt.s32.totalorder %s2719_s17, %s2395_s13 }
  0x42   : > { %p2398_p3 = scmp.lt.s32.totalorder %s2396_s21, %s2390_s20 }
  0x43   : > { %340 = vperm.xlu1 %2121, %v301_v5   ;;  %335 = vperm.xlu0 %2120, %v300_v6  }
  0x44   : > { %1880 = vmatpush3.bf16.msra.mxu0 %v2125_v14  ;;  %p2399_p4 = por %p2398_p3, %p2397_p2 }
  0x45   : > { %1881 = vmatprep.subr.bf16.mxu0 %v2126_v17 }
  0x46   : > { %p2400_p7 = pnand %p2399_p4, %p2393_p12 }
  0x47   : > { %350 = vperm.xlu1 %2121, %v303_v9   ;;  %345 = vperm.xlu0 %2120, %v302_v10  }
  0x48   : > { %1882 = vmatpush3.bf16.msra.mxu0 %v2126_v17 }
  0x49   : > { %1883 = vmatprep.subr.bf16.mxu0 %v2127_v20 }
  0x4b   : > { %360 = vperm.xlu1 %2121, %v305_v12   ;;  %355 = vperm.xlu0 %2120, %v304_v13  }
  0x4c   : > { %1884 = vmatpush3.bf16.msra.mxu0 %v2127_v20 }
  0x4d   : > { %1885 = vmatprep.subr.bf16.mxu0 %v2128_v23 }
  0x4f   : > { %370 = vperm.xlu1 %2121, %v307_v15   ;;  %365 = vperm.xlu0 %2120, %v306_v16  }
  0x50   : > { %1886 = vmatpush3.bf16.msra.mxu0 %v2128_v23 }
  0x51   : > { %1887 = vmatprep.subr.bf16.mxu0 %v2129_v24 }
  0x53   : > { %380 = vperm.xlu1 %2121, %v309_v18   ;;  %375 = vperm.xlu0 %2120, %v308_v19  }
  0x54   : > { %1888 = vmatpush3.bf16.msra.mxu0 %v2129_v24 }
  0x57   : > { %390 = vperm.xlu1 %2121, %v311_v21   ;;  %385 = vperm.xlu0 %2120, %v310_v22  }
  0xba   : > { %v326_v30 = vpop.permute.xlu1 %325  ;;  %v316_v31 = vpop.permute.xlu0 %315 }
  0xbb   : > { %v401_v32 = vmul.f32 %v2613_v28, %v326_v30  ;;  %v399_v33 = vmul.f32 %v2613_v28, %v316_v31 }
  0xbd   : > { %v424_v34 = vadd.f32 %v2618_v29, %v401_v32  ;;  %v422_v35 = vadd.f32 %v2618_v29, %v399_v33 }
  0xbe   : > { %v331_v36 = vpop.permute.xlu1 %330  ;;  %v321_v37 = vpop.permute.xlu0 %320 }
  0xbf   : > { %v402_v38 = vmul.f32 %v2613_v28, %v331_v36  ;;  %v400_v39 = vmul.f32 %v2613_v28, %v321_v37  ;;  %2170 = vtanh.f32 %v424_v34 }
  0xc0   : > { %2172 = vtanh.f32 %v422_v35 }
  0xc1   : > { %v425_v40 = vadd.f32 %v2618_v29, %v402_v38  ;;  %v423_v41 = vadd.f32 %v2618_v29, %v400_v39  ;;  %v2133_v39 = vld [vmem:[#allocation2 + $0x58] sm:$0xff]  }
  0xc2   : > { %v341_v42 = vpop.permute.xlu1 %340  ;;  %v336_v43 = vpop.permute.xlu0 %335  ;;  %1911 = vmatprep.subr.bf16.mxu1 %v2133_v39 }
  0xc3   : > { %2174 = vtanh.f32 %v425_v40  ;;  %v404_v44 = vmul.f32 %v2613_v28, %v341_v42  ;;  %v403_v45 = vmul.f32 %v2613_v28, %v336_v43  ;;  %1912 = vmatpush3.bf16.msra.mxu1 %v2133_v39  ;;  %v2135_v40 = vld [vmem:[#allocation2 + $0x68] sm:$0xff]   ;;  %v2137_v42 = vld [vmem:[#allocation2 + $0x78] sm:$0xff]   ;;  %v2138_v43 = vld [vmem:[#allocation2 + $0x80] sm:$0xff]  }
  0xc4   : > { %2176 = vtanh.f32 %v423_v41  ;;  %v2136_v41 = vld [vmem:[#allocation2 + $0x70] sm:$0xff]   ;;  %1937 = vmatprep.subr.bf16.mxu0 %v2138_v43 }
  0xc5   : > { %v427_v46 = vadd.f32 %v2618_v29, %v404_v44  ;;  %v426_v47 = vadd.f32 %v2618_v29, %v403_v45  ;;  %v2139_v44 = vld [vmem:[#allocation2 + $0x88] sm:$0xff]   ;;  %v2140_v45 = vld [vmem:[#allocation2 + $0x90] sm:$0xff]  }
  0xc6   : > { %v351_v48 = vpop.permute.xlu1 %350  ;;  %v346_v49 = vpop.permute.xlu0 %345 }
  0xc7   : > { %2178 = vtanh.f32 %v427_v46  ;;  %v406_v50 = vmul.f32 %v2613_v28, %v351_v48  ;;  %v405_v51 = vmul.f32 %v2613_v28, %v346_v49  ;;  %v2141_v46 = vld [vmem:[#allocation2 + $0x98] sm:$0xff]  }
  0xc8   : > { %2180 = vtanh.f32 %v426_v47  ;;  %v1713_v47 = vld [vmem:[%s2771_s4] ss:$0 sm:$0xff] }
  0xc9   : > { %v429_v52 = vadd.f32 %v2618_v29, %v406_v50  ;;  %v428_v53 = vadd.f32 %v2618_v29, %v405_v51  ;;  %v2171_v56 = vpop.eup %2170 }
  0xca   : > { %v361_v54 = vpop.permute.xlu1 %360  ;;  %v356_v55 = vpop.permute.xlu0 %355 }
  0xcb   : > { %2182 = vtanh.f32 %v429_v52  ;;  %v408_v57 = vmul.f32 %v2613_v28, %v361_v54  ;;  %v407_v58 = vmul.f32 %v2613_v28, %v356_v55  ;;  %v2173_v59 = vpop.eup %2172 }
  0xcc   : > { %2184 = vtanh.f32 %v428_v53 }
  0xcd   : > { %v2175_v60 = vpop.eup %2174  ;;  %v431_v61 = vadd.f32 %v2618_v29, %v408_v57  ;;  %v430_v62 = vadd.f32 %v2618_v29, %v407_v58 }
  0xce   : > { %v2177_v63 = vpop.eup %2176  ;;  %v371_v0 = vpop.permute.xlu1 %370  ;;  %v455_v2 = vpack.c.bf16 %v2175_v60, %v2171_v56 }
  0xcf   : > { %v366_v1 = vpop.permute.xlu0 %365  ;;  %2186 = vtanh.f32 %v431_v61  ;;  %v410_v3 = vmul.f32 %v2613_v28, %v371_v0  ;;  %v454_v5 = vpack.c.bf16 %v2177_v63, %v2173_v59 }
  0xd0   : > { %v409_v4 = vmul.f32 %v2613_v28, %v366_v1  ;;  %2188 = vtanh.f32 %v430_v62 }
  0xd1   : > { %v2179_v6 = vpop.eup %2178  ;;  %v433_v7 = vadd.f32 %v2618_v29, %v410_v3  ;;  %1889 = vmatprep.mubr.bf16.mxu0 %v454_v5 }
  0xd2   : > { %v432_v8 = vadd.f32 %v2618_v29, %v409_v4  ;;  %v2181_v9 = vpop.eup %2180  ;;  %1890 = vmatmul.mubr.bf16.vlgmr.msra.gmra.mrb[0].mxu0 %v455_v2  ;;  %v381_v10 = vpop.permute.xlu1 %380 }
  0xd3   : > { %v376_v11 = vpop.permute.xlu0 %375  ;;  %2190 = vtanh.f32 %v433_v7  ;;  %v412_v12 = vmul.f32 %v2613_v28, %v381_v10  ;;  %v456_v14 = vpack.c.bf16 %v2179_v6, %v2181_v9  ;;  %1938 = vmatpush3.bf16.msra.mxu0 %v2138_v43  ;;  %v2145_v43 = vld [vmem:[#allocation2 + $0xb8] sm:$0xff]  }
  0xd4   : > { %v411_v13 = vmul.f32 %v2613_v28, %v376_v11  ;;  %2192 = vtanh.f32 %v432_v8  ;;  %1939 = vmatprep.subr.bf16.mxu0 %v2139_v44 }
  0xd5   : > { %v2183_v15 = vpop.eup %2182  ;;  %v435_v16 = vadd.f32 %v2618_v29, %v412_v12  ;;  %1893 = vmatprep.mubr.bf16.mxu0 %v456_v14 }
  0xd6   : > { %v434_v17 = vadd.f32 %v2618_v29, %v411_v13  ;;  %v2185_v18 = vpop.eup %2184  ;;  %v391_v19 = vpop.permute.xlu1 %390 }
  0xd7   : > { %v386_v20 = vpop.permute.xlu0 %385  ;;  %2194 = vtanh.f32 %v435_v16  ;;  %v414_v21 = vmul.f32 %v2613_v28, %v391_v19  ;;  %v457_v23 = vpack.c.bf16 %v2183_v15, %v2185_v18  ;;  %1940 = vmatpush3.bf16.msra.mxu0 %v2139_v44  ;;  %v2146_v44 = vld [vmem:[#allocation2 + $0xc0] sm:$0xff]  }
  0xd8   : > { %v413_v22 = vmul.f32 %v2613_v28, %v386_v20  ;;  %2196 = vtanh.f32 %v434_v17  ;;  %1941 = vmatprep.subr.bf16.mxu0 %v2140_v45 }
  0xd9   : > { %v2187_v24 = vpop.eup %2186  ;;  %v437_v25 = vadd.f32 %v2618_v29, %v414_v21 }
  0xda   : > { %v436_v26 = vadd.f32 %v2618_v29, %v413_v22  ;;  %v2189_v27 = vpop.eup %2188  ;;  %1894 = vmatmul.mubr.bf16.gmra.mrb[4].mxu0 %v457_v23  ;;  %v2134_v29 = vld [vmem:[#allocation2 + $0x60] sm:$0xff]  }
  0xdb   : > { %2198 = vtanh.f32 %v437_v25  ;;  %v458_v30 = vpack.c.bf16 %v2187_v24, %v2189_v27  ;;  %1913 = vmatprep.subr.bf16.mxu1 %v2134_v29  ;;  %1942 = vmatpush3.bf16.msra.mxu0 %v2140_v45  ;;  %v2147_v45 = vld [vmem:[#allocation2 + $0xc8] sm:$0xff]  }
  0xdc   : > { %2200 = vtanh.f32 %v436_v26  ;;  %1914 = vmatpush3.bf16.msra.mxu1 %v2134_v29  ;;  %1943 = vmatprep.subr.bf16.mxu0 %v2141_v46 }
  0xdd   : > { %v2191_v31 = vpop.eup %2190  ;;  %1897 = vmatprep.mubr.bf16.mxu0 %v458_v30  ;;  %1915 = vmatprep.subr.bf16.mxu1 %v2135_v40 }
  0xde   : > { %v2193_v32 = vpop.eup %2192 }
  0xdf   : > { %v459_v33 = vpack.c.bf16 %v2191_v31, %v2193_v32  ;;  %1944 = vmatpush3.bf16.msra.mxu0 %v2141_v46  ;;  %v2148_v46 = vld [vmem:[#allocation2 + $0xd0] sm:$0xff]  }
  0xe0   : > { %1916 = vmatpush3.bf16.msra.mxu1 %v2135_v40  ;;  %v2142_v40 = vld [vmem:[#allocation2 + $0xa0] sm:$0xff]  }
  0xe1   : > { %v2195_v34 = vpop.eup %2194  ;;  %1917 = vmatprep.subr.bf16.mxu1 %v2136_v41  ;;  %1945 = vmatprep.subr.bf16.mxu0 %v2142_v40 }
  0xe2   : > { %v2197_v35 = vpop.eup %2196  ;;  %1898 = vmatmul.mubr.bf16.gmra.mrb[8].mxu0 %v459_v33 }
  0xe3   : > { %v460_v28 = vpack.c.bf16 %v2195_v34, %v2197_v35  ;;  %1946 = vmatpush3.bf16.msra.mxu0 %v2142_v40 }
  0xe4   : > { %1918 = vmatpush3.bf16.msra.mxu1 %v2136_v41  ;;  %v2143_v41 = vld [vmem:[#allocation2 + $0xa8] sm:$0xff]  }
  0xe5   : > { %v2199_v36 = vpop.eup %2198  ;;  %1901 = vmatprep.mubr.bf16.mxu0 %v460_v28  ;;  %1919 = vmatprep.subr.bf16.mxu1 %v2137_v42 }
  0xe6   : > { %v2201_v37 = vpop.eup %2200  ;;  %1947 = vmatprep.subr.bf16.mxu0 %v2143_v41 }
  0xe7   : > { %v461_v38 = vpack.c.bf16 %v2199_v36, %v2201_v37  ;;  %1948 = vmatpush3.bf16.msra.mxu0 %v2143_v41  ;;  %v2150_v41 = vld [vmem:[#allocation2 + $0xe0] sm:$0xff]  }
  0xe8   : > { %1920 = vmatpush3.bf16.msra.mxu1 %v2137_v42  ;;  %v2144_v42 = vld [vmem:[#allocation2 + $0xb0] sm:$0xff]  }
  0xe9   : > { %1949 = vmatprep.subr.bf16.mxu0 %v2144_v42  ;;  %1969 = vmatprep.subr.bf16.mxu1 %v2146_v44 }
  0xea   : > { %1902 = vmatmul.mubr.bf16.gmra.mrb[12].mxu0 %v461_v38 }
  0xeb   : > { %1950 = vmatpush3.bf16.msra.mxu0 %v2144_v42  ;;  %v2151_v42 = vld [vmem:[#allocation2 + $0xe8] sm:$0xff]  }
  0xec   : > { %1951 = vmatprep.subr.bf16.mxu0 %v2145_v43 }
  0xef   : > { %1952 = vmatpush3.bf16.msra.mxu0 %v2145_v43  ;;  %v2152_v43 = vld [vmem:[#allocation2 + $0xf0] sm:$0xff]  }
 0x1a5   : > { %v1891_v48 = vpop.f32.mrb[0].mxu0 }
 0x1a6   : > { %v576_v49 = vadd.f32 %v1891_v48, %v1713_v47  ;;  %v567_v50 = vpop.f32.mrb[1].mxu0  ;;  %v1723_v48 = vld [vmem:[%s2771_s4 + $0x1] ss:$0 sm:$0xff] }
 0x1a7   : > { %v568_v51 = vadd.f32 %v1713_v47, %v567_v50  ;;  %v1892_v52 = vpop.f32.mrb[2].mxu0 }
 0x1a8   : > { %2202 = vtanh.f32 %v576_v49  ;;  %v579_v53 = vadd.f32 %v1892_v52, %v1713_v47  ;;  %v570_v54 = vpop.f32.mrb[3].mxu0 }
 0x1a9   : > { %2204 = vtanh.f32 %v568_v51  ;;  %v571_v55 = vadd.f32 %v1713_v47, %v570_v54 }
 0x1aa   : > { %2206 = vtanh.f32 %v579_v53 }
 0x1ab   : > { %2208 = vtanh.f32 %v571_v55 }
 0x1ad   : > { %v1895_v56 = vpop.f32.mrb[4].mxu0 }
 0x1ae   : > { %v592_v57 = vadd.f32 %v1895_v56, %v1713_v47  ;;  %v583_v58 = vpop.f32.mrb[5].mxu0 }
 0x1af   : > { %v584_v59 = vadd.f32 %v1713_v47, %v583_v58  ;;  %v1896_v60 = vpop.f32.mrb[6].mxu0 }
 0x1b0   : > { %2210 = vtanh.f32 %v592_v57  ;;  %v595_v61 = vadd.f32 %v1896_v60, %v1713_v47  ;;  %v586_v62 = vpop.f32.mrb[7].mxu0 }
 0x1b1   : > { %2212 = vtanh.f32 %v584_v59  ;;  %v587_v63 = vadd.f32 %v1713_v47, %v586_v62 }
 0x1b2   : > { %v2203_v0 = vpop.eup %2202  ;;  %2214 = vtanh.f32 %v595_v61 }
 0x1b3   : > { %v2205_v1 = vpop.eup %2204  ;;  %2216 = vtanh.f32 %v587_v63 }
 0x1b4   : > { %v2207_v2 = vpop.eup %2206 }
 0x1b5   : > { %v2209_v3 = vpop.eup %2208  ;;  %v1899_v4 = vpop.f32.mrb[8].mxu0  ;;  %v647_v5 = vpack.c.bf16 %v2207_v2, %v2203_v0 }
 0x1b6   : > { %v608_v6 = vadd.f32 %v1899_v4, %v1713_v47  ;;  %v599_v7 = vpop.f32.mrb[9].mxu0  ;;  %v646_v8 = vpack.c.bf16 %v2209_v3, %v2205_v1 }
 0x1b7   : > { %v600_v9 = vadd.f32 %v1713_v47, %v599_v7  ;;  %v1900_v10 = vpop.f32.mrb[10].mxu0 }
 0x1b8   : > { %2218 = vtanh.f32 %v608_v6  ;;  %v611_v11 = vadd.f32 %v1900_v10, %v1713_v47  ;;  %v602_v12 = vpop.f32.mrb[11].mxu0  ;;  %1921 = vmatprep.mubr.bf16.mxu1 %v646_v8 }
 0x1b9   : > { %2220 = vtanh.f32 %v600_v9  ;;  %v603_v13 = vadd.f32 %v1713_v47, %v602_v12  ;;  %1922 = vmatmul.mubr.bf16.vlgmr.msra.gmra.mrb[0].mxu1 %v647_v5 }
 0x1ba   : > { %v2211_v14 = vpop.eup %2210  ;;  %2222 = vtanh.f32 %v611_v11  ;;  %1970 = vmatpush3.bf16.msra.mxu1 %v2146_v44  ;;  %v2153_v44 = vld [vmem:[#allocation2 + $0xf8] sm:$0xff]  }
 0x1bb   : > { %v2213_v15 = vpop.eup %2212  ;;  %2224 = vtanh.f32 %v603_v13  ;;  %1971 = vmatprep.subr.bf16.mxu1 %v2147_v45 }
 0x1bc   : > { %v2215_v16 = vpop.eup %2214 }
 0x1bd   : > { %v2217_v17 = vpop.eup %2216  ;;  %v1903_v18 = vpop.f32.mrb[12].mxu0  ;;  %v649_v19 = vpack.c.bf16 %v2215_v16, %v2211_v14 }
 0x1be   : > { %v624_v20 = vadd.f32 %v1903_v18, %v1713_v47  ;;  %v615_v21 = vpop.f32.mrb[13].mxu0  ;;  %v648_v22 = vpack.c.bf16 %v2217_v17, %v2213_v15  ;;  %1972 = vmatpush3.bf16.msra.mxu1 %v2147_v45  ;;  %v2154_v45 = vld [vmem:[#allocation2 + $0x100] sm:$0xff]  }
 0x1bf   : > { %v616_v23 = vadd.f32 %v1713_v47, %v615_v21  ;;  %v1904_v24 = vpop.f32.mrb[14].mxu0  ;;  %1973 = vmatprep.subr.bf16.mxu1 %v2148_v46  ;;  %2001 = vmatprep.subr.bf16.mxu0 %v2154_v45 }
 0x1c0   : > { %2226 = vtanh.f32 %v624_v20  ;;  %v627_v25 = vadd.f32 %v1904_v24, %v1713_v47  ;;  %v618_v26 = vpop.f32.mrb[15].mxu0  ;;  %1925 = vmatprep.mubr.bf16.mxu1 %v648_v22 }
 0x1c1   : > { %2228 = vtanh.f32 %v616_v23  ;;  %v619_v27 = vadd.f32 %v1713_v47, %v618_v26  ;;  %1926 = vmatmul.mubr.bf16.gmra.mrb[4].mxu1 %v649_v19  ;;  %v2149_v47 = vld [vmem:[#allocation2 + $0xd8] sm:$0xff]  }
 0x1c2   : > { %v2219_v30 = vpop.eup %2218  ;;  %2230 = vtanh.f32 %v627_v25  ;;  %1974 = vmatpush3.bf16.msra.mxu1 %v2148_v46  ;;  %v2155_v46 = vld [vmem:[#allocation2 + $0x108] sm:$0xff]  }
 0x1c3   : > { %v2221_v31 = vpop.eup %2220  ;;  %2232 = vtanh.f32 %v619_v27  ;;  %1975 = vmatprep.subr.bf16.mxu1 %v2149_v47 }
 0x1c4   : > { %v2223_v32 = vpop.eup %2222 }
 0x1c5   : > { %v2225_v33 = vpop.eup %2224  ;;  %v651_v34 = vpack.c.bf16 %v2223_v32, %v2219_v30 }
 0x1c6   : > { %v650_v35 = vpack.c.bf16 %v2225_v33, %v2221_v31  ;;  %1976 = vmatpush3.bf16.msra.mxu1 %v2149_v47  ;;  %v2156_v47 = vld [vmem:[#allocation2 + $0x110] sm:$0xff]  }
 0x1c7   : > { %1977 = vmatprep.subr.bf16.mxu1 %v2150_v41 }
 0x1c8   : > { %1929 = vmatprep.mubr.bf16.mxu1 %v650_v35 }
 0x1c9   : > { %1930 = vmatmul.mubr.bf16.gmra.mrb[8].mxu1 %v651_v34 }
 0x1ca   : > { %v2227_v28 = vpop.eup %2226  ;;  %1978 = vmatpush3.bf16.msra.mxu1 %v2150_v41 }
 0x1cb   : > { %v2229_v36 = vpop.eup %2228  ;;  %1979 = vmatprep.subr.bf16.mxu1 %v2151_v42 }
 0x1cc   : > { %v2231_v37 = vpop.eup %2230 }
 0x1cd   : > { %v2233_v38 = vpop.eup %2232  ;;  %v653_v39 = vpack.c.bf16 %v2231_v37, %v2227_v28 }
 0x1ce   : > { %v652_v29 = vpack.c.bf16 %v2233_v38, %v2229_v36  ;;  %1980 = vmatpush3.bf16.msra.mxu1 %v2151_v42  ;;  %v2158_v42 = vld [vmem:[#allocation2 + $0x120] sm:$0xff]  }
 0x1cf   : > { %1981 = vmatprep.subr.bf16.mxu1 %v2152_v43 }
 0x1d0   : > { %1933 = vmatprep.mubr.bf16.mxu1 %v652_v29 }
 0x1d1   : > { %1934 = vmatmul.mubr.bf16.gmra.mrb[12].mxu1 %v653_v39 }
 0x1d2   : > { %1982 = vmatpush3.bf16.msra.mxu1 %v2152_v43  ;;  %v2159_v43 = vld [vmem:[#allocation2 + $0x128] sm:$0xff]  }
 0x1d3   : > { %1983 = vmatprep.subr.bf16.mxu1 %v2153_v44 }
 0x1d6   : > { %1984 = vmatpush3.bf16.msra.mxu1 %v2153_v44  ;;  %v2160_v44 = vld [vmem:[#allocation2 + $0x130] sm:$0xff]  }
 0x28c   : > { %v1923_v49 = vpop.f32.mrb[0].mxu1 }
 0x28d   : > { %v770_v50 = vadd.f32 %v1923_v49, %v1723_v48  ;;  %v761_v51 = vpop.f32.mrb[1].mxu1  ;;  %v1733_v49 = vld [vmem:[%s2771_s4 + $0x2] ss:$0 sm:$0xff] }
 0x28e   : > { %v762_v52 = vadd.f32 %v1723_v48, %v761_v51  ;;  %v1924_v53 = vpop.f32.mrb[2].mxu1 }
 0x28f   : > { %2234 = vtanh.f32 %v770_v50  ;;  %v773_v54 = vadd.f32 %v1924_v53, %v1723_v48  ;;  %v764_v55 = vpop.f32.mrb[3].mxu1 }
 0x290   : > { %2236 = vtanh.f32 %v762_v52  ;;  %v765_v56 = vadd.f32 %v1723_v48, %v764_v55 }
 0x291   : > { %2238 = vtanh.f32 %v773_v54 }
 0x292   : > { %2240 = vtanh.f32 %v765_v56 }
 0x294   : > { %v1927_v57 = vpop.f32.mrb[4].mxu1 }
 0x295   : > { %v786_v58 = vadd.f32 %v1927_v57, %v1723_v48  ;;  %v777_v59 = vpop.f32.mrb[5].mxu1 }
 0x296   : > { %v778_v60 = vadd.f32 %v1723_v48, %v777_v59  ;;  %v1928_v61 = vpop.f32.mrb[6].mxu1 }
 0x297   : > { %2242 = vtanh.f32 %v786_v58  ;;  %v789_v62 = vadd.f32 %v1928_v61, %v1723_v48  ;;  %v780_v63 = vpop.f32.mrb[7].mxu1 }
 0x298   : > { %2244 = vtanh.f32 %v778_v60  ;;  %v781_v0 = vadd.f32 %v1723_v48, %v780_v63 }
 0x299   : > { %v2235_v1 = vpop.eup %2234  ;;  %2246 = vtanh.f32 %v789_v62 }
 0x29a   : > { %v2237_v2 = vpop.eup %2236  ;;  %2248 = vtanh.f32 %v781_v0 }
 0x29b   : > { %v2239_v3 = vpop.eup %2238 }
 0x29c   : > { %v2241_v4 = vpop.eup %2240  ;;  %v1931_v5 = vpop.f32.mrb[8].mxu1  ;;  %v841_v6 = vpack.c.bf16 %v2239_v3, %v2235_v1 }
 0x29d   : > { %v802_v7 = vadd.f32 %v1931_v5, %v1723_v48  ;;  %v793_v8 = vpop.f32.mrb[9].mxu1  ;;  %v840_v9 = vpack.c.bf16 %v2241_v4, %v2237_v2 }
 0x29e   : > { %v794_v10 = vadd.f32 %v1723_v48, %v793_v8  ;;  %v1932_v11 = vpop.f32.mrb[10].mxu1 }
 0x29f   : > { %2250 = vtanh.f32 %v802_v7  ;;  %v805_v12 = vadd.f32 %v1932_v11, %v1723_v48  ;;  %v796_v13 = vpop.f32.mrb[11].mxu1  ;;  %1953 = vmatprep.mubr.bf16.mxu0 %v840_v9 }
 0x2a0   : > { %2252 = vtanh.f32 %v794_v10  ;;  %v797_v14 = vadd.f32 %v1723_v48, %v796_v13  ;;  %1954 = vmatmul.mubr.bf16.vlgmr.msra.gmra.mrb[16].mxu0 %v841_v6 }
 0x2a1   : > { %v2243_v15 = vpop.eup %2242  ;;  %2254 = vtanh.f32 %v805_v12  ;;  %2002 = vmatpush3.bf16.msra.mxu0 %v2154_v45  ;;  %v2161_v45 = vld [vmem:[#allocation2 + $0x138] sm:$0xff]  }
 0x2a2   : > { %v2245_v16 = vpop.eup %2244  ;;  %2256 = vtanh.f32 %v797_v14  ;;  %2003 = vmatprep.subr.bf16.mxu0 %v2155_v46 }
 0x2a3   : > { %v2247_v17 = vpop.eup %2246 }
 0x2a4   : > { %v2249_v18 = vpop.eup %2248  ;;  %v1935_v19 = vpop.f32.mrb[12].mxu1  ;;  %v843_v20 = vpack.c.bf16 %v2247_v17, %v2243_v15 }
 0x2a5   : > { %v818_v21 = vadd.f32 %v1935_v19, %v1723_v48  ;;  %v809_v22 = vpop.f32.mrb[13].mxu1  ;;  %v842_v23 = vpack.c.bf16 %v2249_v18, %v2245_v16  ;;  %2004 = vmatpush3.bf16.msra.mxu0 %v2155_v46  ;;  %v2162_v46 = vld [vmem:[%s2772_s5] sm:$0xff]  }
 0x2a6   : > { %v810_v24 = vadd.f32 %v1723_v48, %v809_v22  ;;  %v1936_v25 = vpop.f32.mrb[14].mxu1  ;;  %2005 = vmatprep.subr.bf16.mxu0 %v2156_v47  ;;  %2033 = vmatprep.subr.bf16.mxu1 %v2162_v46 }
 0x2a7   : > { %2258 = vtanh.f32 %v818_v21  ;;  %v821_v26 = vadd.f32 %v1936_v25, %v1723_v48  ;;  %v812_v27 = vpop.f32.mrb[15].mxu1  ;;  %1957 = vmatprep.mubr.bf16.mxu0 %v842_v23 }
 0x2a8   : > { %2260 = vtanh.f32 %v810_v24  ;;  %v813_v30 = vadd.f32 %v1723_v48, %v812_v27  ;;  %1958 = vmatmul.mubr.bf16.gmra.mrb[20].mxu0 %v843_v20  ;;  %v2157_v48 = vld [vmem:[#allocation2 + $0x118] sm:$0xff]  }
 0x2a9   : > { %v2251_v31 = vpop.eup %2250  ;;  %2262 = vtanh.f32 %v821_v26  ;;  %2006 = vmatpush3.bf16.msra.mxu0 %v2156_v47  ;;  %v2163_v47 = vld [vmem:[%s2772_s5 + $0x8] sm:$0xff]  }
 0x2aa   : > { %v2253_v32 = vpop.eup %2252  ;;  %2264 = vtanh.f32 %v813_v30  ;;  %2007 = vmatprep.subr.bf16.mxu0 %v2157_v48 }
 0x2ab   : > { %v2255_v33 = vpop.eup %2254 }
 0x2ac   : > { %v2257_v34 = vpop.eup %2256  ;;  %v845_v35 = vpack.c.bf16 %v2255_v33, %v2251_v31 }
 0x2ad   : > { %v844_v28 = vpack.c.bf16 %v2257_v34, %v2253_v32  ;;  %2008 = vmatpush3.bf16.msra.mxu0 %v2157_v48  ;;  %v2164_v48 = vld [vmem:[%s2772_s5 + $0x10] sm:$0xff]  }
 0x2ae   : > { %2009 = vmatprep.subr.bf16.mxu0 %v2158_v42 }
 0x2af   : > { %1961 = vmatprep.mubr.bf16.mxu0 %v844_v28 }
 0x2b0   : > { %1962 = vmatmul.mubr.bf16.gmra.mrb[24].mxu0 %v845_v35 }
 0x2b1   : > { %v2259_v36 = vpop.eup %2258  ;;  %2010 = vmatpush3.bf16.msra.mxu0 %v2158_v42 }
 0x2b2   : > { %v2261_v37 = vpop.eup %2260  ;;  %2011 = vmatprep.subr.bf16.mxu0 %v2159_v43 }
 0x2b3   : > { %v2263_v38 = vpop.eup %2262 }
 0x2b4   : > { %v2265_v39 = vpop.eup %2264  ;;  %v847_v29 = vpack.c.bf16 %v2263_v38, %v2259_v36 }
 0x2b5   : > { %v846_v40 = vpack.c.bf16 %v2265_v39, %v2261_v37  ;;  %2012 = vmatpush3.bf16.msra.mxu0 %v2159_v43  ;;  %v2166_v43 = vld [vmem:[%s2772_s5 + $0x20] sm:$0xff]  }
 0x2b6   : > { %2013 = vmatprep.subr.bf16.mxu0 %v2160_v44 }
 0x2b7   : > { %1965 = vmatprep.mubr.bf16.mxu0 %v846_v40 }
 0x2b8   : > { %1966 = vmatmul.mubr.bf16.gmra.mrb[28].mxu0 %v847_v29 }
 0x2b9   : > { %2014 = vmatpush3.bf16.msra.mxu0 %v2160_v44  ;;  %v2167_v44 = vld [vmem:[%s2772_s5 + $0x28] sm:$0xff]  }
 0x2ba   : > { %2015 = vmatprep.subr.bf16.mxu0 %v2161_v45 }
 0x2bd   : > { %2016 = vmatpush3.bf16.msra.mxu0 %v2161_v45  ;;  %v2168_v45 = vld [vmem:[%s2772_s5 + $0x30] sm:$0xff]  }
 0x373   : > { %v1955_v50 = vpop.f32.mrb[16].mxu0 }
 0x374   : > { %v964_v51 = vadd.f32 %v1955_v50, %v1733_v49  ;;  %v955_v52 = vpop.f32.mrb[17].mxu0  ;;  %v1743_v50 = vld [vmem:[%s2771_s4 + $0x3] ss:$0 sm:$0xff] }
 0x375   : > { %v956_v53 = vadd.f32 %v1733_v49, %v955_v52  ;;  %v1956_v54 = vpop.f32.mrb[18].mxu0 }
 0x376   : > { %2266 = vtanh.f32 %v964_v51  ;;  %v967_v55 = vadd.f32 %v1956_v54, %v1733_v49  ;;  %v958_v56 = vpop.f32.mrb[19].mxu0 }
 0x377   : > { %2268 = vtanh.f32 %v956_v53  ;;  %v959_v57 = vadd.f32 %v1733_v49, %v958_v56 }
 0x378   : > { %2270 = vtanh.f32 %v967_v55 }
 0x379   : > { %2272 = vtanh.f32 %v959_v57 }
 0x37b   : > { %v1959_v58 = vpop.f32.mrb[20].mxu0 }
 0x37c   : > { %v980_v59 = vadd.f32 %v1959_v58, %v1733_v49  ;;  %v971_v60 = vpop.f32.mrb[21].mxu0 }
 0x37d   : > { %v972_v61 = vadd.f32 %v1733_v49, %v971_v60  ;;  %v1960_v62 = vpop.f32.mrb[22].mxu0 }
 0x37e   : > { %2274 = vtanh.f32 %v980_v59  ;;  %v983_v63 = vadd.f32 %v1960_v62, %v1733_v49  ;;  %v974_v0 = vpop.f32.mrb[23].mxu0 }
 0x37f   : > { %2276 = vtanh.f32 %v972_v61  ;;  %v975_v1 = vadd.f32 %v1733_v49, %v974_v0 }
 0x380   : > { %v2267_v2 = vpop.eup %2266  ;;  %2278 = vtanh.f32 %v983_v63 }
 0x381   : > { %v2269_v3 = vpop.eup %2268  ;;  %2280 = vtanh.f32 %v975_v1 }
 0x382   : > { %v2271_v4 = vpop.eup %2270 }
 0x383   : > { %v2273_v5 = vpop.eup %2272  ;;  %v1963_v6 = vpop.f32.mrb[24].mxu0  ;;  %v1035_v7 = vpack.c.bf16 %v2271_v4, %v2267_v2 }
 0x384   : > { %v996_v8 = vadd.f32 %v1963_v6, %v1733_v49  ;;  %v987_v9 = vpop.f32.mrb[25].mxu0  ;;  %v1034_v10 = vpack.c.bf16 %v2273_v5, %v2269_v3 }
 0x385   : > { %v988_v11 = vadd.f32 %v1733_v49, %v987_v9  ;;  %v1964_v12 = vpop.f32.mrb[26].mxu0 }
 0x386   : > { %2282 = vtanh.f32 %v996_v8  ;;  %v999_v13 = vadd.f32 %v1964_v12, %v1733_v49  ;;  %v990_v14 = vpop.f32.mrb[27].mxu0  ;;  %1985 = vmatprep.mubr.bf16.mxu1 %v1034_v10 }
 0x387   : > { %2284 = vtanh.f32 %v988_v11  ;;  %v991_v15 = vadd.f32 %v1733_v49, %v990_v14  ;;  %1986 = vmatmul.mubr.bf16.vlgmr.msra.gmra.mrb[16].mxu1 %v1035_v7 }
 0x388   : > { %v2275_v16 = vpop.eup %2274  ;;  %2286 = vtanh.f32 %v999_v13  ;;  %2034 = vmatpush3.bf16.msra.mxu1 %v2162_v46  ;;  %v2169_v46 = vld [vmem:[%s2772_s5 + $0x38] sm:$0xff]  }
 0x389   : > { %v2277_v17 = vpop.eup %2276  ;;  %2288 = vtanh.f32 %v991_v15  ;;  %2035 = vmatprep.subr.bf16.mxu1 %v2163_v47 }
 0x38a   : > { %v2279_v18 = vpop.eup %2278 }
 0x38b   : > { %v2281_v19 = vpop.eup %2280  ;;  %v1967_v20 = vpop.f32.mrb[28].mxu0  ;;  %v1037_v21 = vpack.c.bf16 %v2279_v18, %v2275_v16 }
 0x38c   : > { %v1012_v22 = vadd.f32 %v1967_v20, %v1733_v49  ;;  %v1003_v23 = vpop.f32.mrb[29].mxu0  ;;  %v1036_v24 = vpack.c.bf16 %v2281_v19, %v2277_v17  ;;  %2036 = vmatpush3.bf16.msra.mxu1 %v2163_v47  ;;  %v1753_v47 = vld [vmem:[%s2771_s4 + $0x4] ss:$0 sm:$0xff] }
 0x38d   : > { %v1004_v25 = vadd.f32 %v1733_v49, %v1003_v23  ;;  %v1968_v26 = vpop.f32.mrb[30].mxu0  ;;  %2037 = vmatprep.subr.bf16.mxu1 %v2164_v48 }
 0x38e   : > { %2290 = vtanh.f32 %v1012_v22  ;;  %v1015_v27 = vadd.f32 %v1968_v26, %v1733_v49  ;;  %v1006_v30 = vpop.f32.mrb[31].mxu0  ;;  %1989 = vmatprep.mubr.bf16.mxu1 %v1036_v24 }
 0x38f   : > { %2292 = vtanh.f32 %v1004_v25  ;;  %v1007_v31 = vadd.f32 %v1733_v49, %v1006_v30  ;;  %1990 = vmatmul.mubr.bf16.gmra.mrb[20].mxu1 %v1037_v21  ;;  %v2165_v49 = vld [vmem:[%s2772_s5 + $0x18] sm:$0xff]  }
 0x390   : > { %v2283_v32 = vpop.eup %2282  ;;  %2294 = vtanh.f32 %v1015_v27  ;;  %2038 = vmatpush3.bf16.msra.mxu1 %v2164_v48 }
 0x391   : > { %v2285_v33 = vpop.eup %2284  ;;  %2296 = vtanh.f32 %v1007_v31  ;;  %2039 = vmatprep.subr.bf16.mxu1 %v2165_v49 }
 0x392   : > { %v2287_v34 = vpop.eup %2286 }
 0x393   : > { %v2289_v35 = vpop.eup %2288  ;;  %v1039_v28 = vpack.c.bf16 %v2287_v34, %v2283_v32 }
 0x394   : > { %v1038_v36 = vpack.c.bf16 %v2289_v35, %v2285_v33  ;;  %2040 = vmatpush3.bf16.msra.mxu1 %v2165_v49 }
 0x395   : > { %2041 = vmatprep.subr.bf16.mxu1 %v2166_v43 }
 0x396   : > { %1993 = vmatprep.mubr.bf16.mxu1 %v1038_v36 }
 0x397   : > { %1994 = vmatmul.mubr.bf16.gmra.mrb[24].mxu1 %v1039_v28 }
 0x398   : > { %v2291_v37 = vpop.eup %2290  ;;  %2042 = vmatpush3.bf16.msra.mxu1 %v2166_v43 }
 0x399   : > { %v2293_v38 = vpop.eup %2292  ;;  %2043 = vmatprep.subr.bf16.mxu1 %v2167_v44 }
 0x39a   : > { %v2295_v39 = vpop.eup %2294 }
 0x39b   : > { %v2297_v29 = vpop.eup %2296  ;;  %v1041_v40 = vpack.c.bf16 %v2295_v39, %v2291_v37 }
 0x39c   : > { %v1040_v41 = vpack.c.bf16 %v2297_v29, %v2293_v38  ;;  %2044 = vmatpush3.bf16.msra.mxu1 %v2167_v44 }
 0x39d   : > { %2045 = vmatprep.subr.bf16.mxu1 %v2168_v45 }
 0x39e   : > { %1997 = vmatprep.mubr.bf16.mxu1 %v1040_v41 }
 0x39f   : > { %1998 = vmatmul.mubr.bf16.gmra.mrb[28].mxu1 %v1041_v40 }
 0x3a0   : > { %2046 = vmatpush3.bf16.msra.mxu1 %v2168_v45 }
 0x3a1   : > { %2047 = vmatprep.subr.bf16.mxu1 %v2169_v46 }
 0x3a4   : > { %2048 = vmatpush3.bf16.msra.mxu1 %v2169_v46 }
 0x45a   : > { %v1987_v51 = vpop.f32.mrb[16].mxu1 }
 0x45b   : > { %v1158_v52 = vadd.f32 %v1987_v51, %v1743_v50  ;;  %v1149_v53 = vpop.f32.mrb[17].mxu1 }
 0x45c   : > { %v1150_v54 = vadd.f32 %v1743_v50, %v1149_v53  ;;  %v1988_v55 = vpop.f32.mrb[18].mxu1 }
 0x45d   : > { %2298 = vtanh.f32 %v1158_v52  ;;  %v1161_v56 = vadd.f32 %v1988_v55, %v1743_v50  ;;  %v1152_v57 = vpop.f32.mrb[19].mxu1 }
 0x45e   : > { %2300 = vtanh.f32 %v1150_v54  ;;  %v1153_v58 = vadd.f32 %v1743_v50, %v1152_v57 }
 0x45f   : > { %2302 = vtanh.f32 %v1161_v56 }
 0x460   : > { %2304 = vtanh.f32 %v1153_v58 }
 0x462   : > { %v1991_v59 = vpop.f32.mrb[20].mxu1 }
 0x463   : > { %v1174_v60 = vadd.f32 %v1991_v59, %v1743_v50  ;;  %v1165_v61 = vpop.f32.mrb[21].mxu1 }
 0x464   : > { %v1166_v62 = vadd.f32 %v1743_v50, %v1165_v61  ;;  %v1992_v63 = vpop.f32.mrb[22].mxu1 }
 0x465   : > { %2306 = vtanh.f32 %v1174_v60  ;;  %v1177_v0 = vadd.f32 %v1992_v63, %v1743_v50  ;;  %v1168_v1 = vpop.f32.mrb[23].mxu1 }
 0x466   : > { %2308 = vtanh.f32 %v1166_v62  ;;  %v1169_v2 = vadd.f32 %v1743_v50, %v1168_v1 }
 0x467   : > { %v2299_v3 = vpop.eup %2298  ;;  %2310 = vtanh.f32 %v1177_v0 }
 0x468   : > { %v2301_v4 = vpop.eup %2300  ;;  %2312 = vtanh.f32 %v1169_v2 }
 0x469   : > { %v2303_v5 = vpop.eup %2302 }
 0x46a   : > { %v2305_v6 = vpop.eup %2304  ;;  %v1995_v7 = vpop.f32.mrb[24].mxu1  ;;  %v1229_v8 = vpack.c.bf16 %v2303_v5, %v2299_v3 }
 0x46b   : > { %v1190_v9 = vadd.f32 %v1995_v7, %v1743_v50  ;;  %v1181_v10 = vpop.f32.mrb[25].mxu1  ;;  %v1228_v11 = vpack.c.bf16 %v2305_v6, %v2301_v4 }
 0x46c   : > { %v1182_v12 = vadd.f32 %v1743_v50, %v1181_v10  ;;  %v1996_v13 = vpop.f32.mrb[26].mxu1 }
 0x46d   : > { %2314 = vtanh.f32 %v1190_v9  ;;  %v1193_v14 = vadd.f32 %v1996_v13, %v1743_v50  ;;  %v1184_v15 = vpop.f32.mrb[27].mxu1  ;;  %2017 = vmatprep.mubr.bf16.mxu0 %v1228_v11 }
 0x46e   : > { %2316 = vtanh.f32 %v1182_v12  ;;  %v1185_v16 = vadd.f32 %v1743_v50, %v1184_v15  ;;  %2018 = vmatmul.mubr.bf16.vlgmr.msra.gmra.mrb[32].mxu0 %v1229_v8 }
 0x46f   : > { %v2307_v17 = vpop.eup %2306  ;;  %2318 = vtanh.f32 %v1193_v14 }
 0x470   : > { %v2309_v18 = vpop.eup %2308  ;;  %2320 = vtanh.f32 %v1185_v16 }
 0x471   : > { %v2311_v19 = vpop.eup %2310 }
 0x472   : > { %v2313_v20 = vpop.eup %2312  ;;  %v1999_v21 = vpop.f32.mrb[28].mxu1  ;;  %v1231_v22 = vpack.c.bf16 %v2311_v19, %v2307_v17 }
 0x473   : > { %v1206_v23 = vadd.f32 %v1999_v21, %v1743_v50  ;;  %v1197_v24 = vpop.f32.mrb[29].mxu1  ;;  %v1230_v25 = vpack.c.bf16 %v2313_v20, %v2309_v18 }
 0x474   : > { %v1198_v26 = vadd.f32 %v1743_v50, %v1197_v24  ;;  %v2000_v27 = vpop.f32.mrb[30].mxu1 }
 0x475   : > { %2322 = vtanh.f32 %v1206_v23  ;;  %v1209_v30 = vadd.f32 %v2000_v27, %v1743_v50  ;;  %v1200_v31 = vpop.f32.mrb[31].mxu1  ;;  %2021 = vmatprep.mubr.bf16.mxu0 %v1230_v25 }
 0x476   : > { %2324 = vtanh.f32 %v1198_v26  ;;  %v1201_v32 = vadd.f32 %v1743_v50, %v1200_v31  ;;  %2022 = vmatmul.mubr.bf16.gmra.mrb[36].mxu0 %v1231_v22 }
 0x477   : > { %v2315_v33 = vpop.eup %2314  ;;  %2326 = vtanh.f32 %v1209_v30 }
 0x478   : > { %v2317_v34 = vpop.eup %2316  ;;  %2328 = vtanh.f32 %v1201_v32 }
 0x479   : > { %v2319_v35 = vpop.eup %2318 }
 0x47a   : > { %v2321_v28 = vpop.eup %2320  ;;  %v1233_v36 = vpack.c.bf16 %v2319_v35, %v2315_v33 }
 0x47b   : > { %v1232_v37 = vpack.c.bf16 %v2321_v28, %v2317_v34 }
 0x47d   : > { %2025 = vmatprep.mubr.bf16.mxu0 %v1232_v37 }
 0x47e   : > { %2026 = vmatmul.mubr.bf16.gmra.mrb[40].mxu0 %v1233_v36 }
 0x47f   : > { %v2323_v38 = vpop.eup %2322 }
 0x480   : > { %v2325_v39 = vpop.eup %2324 }
 0x481   : > { %v2327_v29 = vpop.eup %2326 }
 0x482   : > { %v2329_v40 = vpop.eup %2328  ;;  %v1235_v41 = vpack.c.bf16 %v2327_v29, %v2323_v38 }
 0x483   : > { %v1234_v42 = vpack.c.bf16 %v2329_v40, %v2325_v39  ;;  %v1762_v40 = vld [vmem:[%s2773_s6] ss:$0 sm:$0xff] }
 0x485   : > { %2029 = vmatprep.mubr.bf16.mxu0 %v1234_v42 }
 0x486   : > { %2030 = vmatmul.mubr.bf16.gmra.mrb[44].mxu0 %v1235_v41 }
 0x541   : > { %v2019_v48 = vpop.f32.mrb[32].mxu0 }
 0x542   : > { %v1352_v49 = vadd.f32 %v2019_v48, %v1753_v47  ;;  %v1343_v50 = vpop.f32.mrb[33].mxu0 }
 0x543   : > { %v1344_v51 = vadd.f32 %v1753_v47, %v1343_v50  ;;  %v2020_v52 = vpop.f32.mrb[34].mxu0 }
 0x544   : > { %2330 = vtanh.f32 %v1352_v49  ;;  %v1355_v53 = vadd.f32 %v2020_v52, %v1753_v47  ;;  %v1346_v54 = vpop.f32.mrb[35].mxu0 }
 0x545   : > { %2332 = vtanh.f32 %v1344_v51  ;;  %v1347_v55 = vadd.f32 %v1753_v47, %v1346_v54 }
 0x546   : > { %2334 = vtanh.f32 %v1355_v53 }
 0x547   : > { %2336 = vtanh.f32 %v1347_v55 }
 0x549   : > { %v2023_v56 = vpop.f32.mrb[36].mxu0 }
 0x54a   : > { %v1368_v57 = vadd.f32 %v2023_v56, %v1753_v47  ;;  %v1359_v58 = vpop.f32.mrb[37].mxu0 }
 0x54b   : > { %v1360_v59 = vadd.f32 %v1753_v47, %v1359_v58  ;;  %v2024_v60 = vpop.f32.mrb[38].mxu0 }
 0x54c   : > { %2338 = vtanh.f32 %v1368_v57  ;;  %v1371_v61 = vadd.f32 %v2024_v60, %v1753_v47  ;;  %v1362_v62 = vpop.f32.mrb[39].mxu0 }
 0x54d   : > { %2340 = vtanh.f32 %v1360_v59  ;;  %v1363_v63 = vadd.f32 %v1753_v47, %v1362_v62 }
 0x54e   : > { %v2331_v0 = vpop.eup %2330  ;;  %2342 = vtanh.f32 %v1371_v61 }
 0x54f   : > { %v2333_v1 = vpop.eup %2332  ;;  %2344 = vtanh.f32 %v1363_v63 }
 0x550   : > { %v2335_v2 = vpop.eup %2334 }
 0x551   : > { %v2337_v3 = vpop.eup %2336  ;;  %v2027_v4 = vpop.f32.mrb[40].mxu0  ;;  %v1423_v5 = vpack.c.bf16 %v2335_v2, %v2331_v0 }
 0x552   : > { %v1384_v6 = vadd.f32 %v2027_v4, %v1753_v47  ;;  %v1375_v7 = vpop.f32.mrb[41].mxu0  ;;  %v1422_v8 = vpack.c.bf16 %v2337_v3, %v2333_v1 }
 0x553   : > { %v1376_v9 = vadd.f32 %v1753_v47, %v1375_v7  ;;  %v2028_v10 = vpop.f32.mrb[42].mxu0 }
 0x554   : > { %2346 = vtanh.f32 %v1384_v6  ;;  %v1387_v11 = vadd.f32 %v2028_v10, %v1753_v47  ;;  %v1378_v12 = vpop.f32.mrb[43].mxu0  ;;  %2049 = vmatprep.mubr.bf16.mxu1 %v1422_v8 }
 0x555   : > { %2348 = vtanh.f32 %v1376_v9  ;;  %v1379_v13 = vadd.f32 %v1753_v47, %v1378_v12  ;;  %2050 = vmatmul.mubr.bf16.vlgmr.msra.gmra.mrb[32].mxu1 %v1423_v5 }
 0x556   : > { %v2339_v14 = vpop.eup %2338  ;;  %2350 = vtanh.f32 %v1387_v11 }
 0x557   : > { %v2341_v15 = vpop.eup %2340  ;;  %2352 = vtanh.f32 %v1379_v13 }
 0x558   : > { %v2343_v16 = vpop.eup %2342 }
 0x559   : > { %v2345_v17 = vpop.eup %2344  ;;  %v2031_v18 = vpop.f32.mrb[44].mxu0  ;;  %v1425_v19 = vpack.c.bf16 %v2343_v16, %v2339_v14 }
 0x55a   : > { %v1400_v20 = vadd.f32 %v2031_v18, %v1753_v47  ;;  %v1391_v21 = vpop.f32.mrb[45].mxu0  ;;  %v1424_v22 = vpack.c.bf16 %v2345_v17, %v2341_v15 }
 0x55b   : > { %v1392_v23 = vadd.f32 %v1753_v47, %v1391_v21  ;;  %v2032_v24 = vpop.f32.mrb[46].mxu0 }
 0x55c   : > { %2354 = vtanh.f32 %v1400_v20  ;;  %v1403_v25 = vadd.f32 %v2032_v24, %v1753_v47  ;;  %v1394_v26 = vpop.f32.mrb[47].mxu0  ;;  %2053 = vmatprep.mubr.bf16.mxu1 %v1424_v22 }
 0x55d   : > { %2356 = vtanh.f32 %v1392_v23  ;;  %v1395_v27 = vadd.f32 %v1753_v47, %v1394_v26  ;;  %2054 = vmatmul.mubr.bf16.gmra.mrb[36].mxu1 %v1425_v19 }
 0x55e   : > { %v2347_v30 = vpop.eup %2346  ;;  %2358 = vtanh.f32 %v1403_v25 }
 0x55f   : > { %v2349_v31 = vpop.eup %2348  ;;  %2360 = vtanh.f32 %v1395_v27 }
 0x560   : > { %v2351_v32 = vpop.eup %2350 }
 0x561   : > { %v2353_v33 = vpop.eup %2352  ;;  %v1427_v34 = vpack.c.bf16 %v2351_v32, %v2347_v30 }
 0x562   : > { %v1426_v35 = vpack.c.bf16 %v2353_v33, %v2349_v31 }
 0x564   : > { %2057 = vmatprep.mubr.bf16.mxu1 %v1426_v35 }
 0x565   : > { %2058 = vmatmul.mubr.bf16.gmra.mrb[40].mxu1 %v1427_v34 }
 0x566   : > { %v2355_v28 = vpop.eup %2354 }
 0x567   : > { %v2357_v36 = vpop.eup %2356 }
 0x568   : > { %v2359_v37 = vpop.eup %2358 }
 0x569   : > { %v2361_v38 = vpop.eup %2360  ;;  %v1429_v39 = vpack.c.bf16 %v2359_v37, %v2355_v28 }
 0x56a   : > { %v1428_v29 = vpack.c.bf16 %v2361_v38, %v2357_v36 }
 0x56c   : > { %2061 = vmatprep.mubr.bf16.mxu1 %v1428_v29 }
 0x56d   : > { %2062 = vmatmul.mubr.bf16.gmra.mrb[44].mxu1 %v1429_v39 }
 0x628   : > { %v2051_v41 = vpop.f32.mrb[32].mxu1 }
 0x629   : > { %v1544_v42 = vadd.f32 %v2051_v41, %v1762_v40  ;;  %v1535_v43 = vpop.f32.mrb[33].mxu1 }
 0x62a   : > { %v1536_v44 = vadd.f32 %v1762_v40, %v1535_v43  ;;  %v2052_v45 = vpop.f32.mrb[34].mxu1 }
 0x62b   : > { %1600 = vst [vmem:[%s2697_s9 + $0x10] sm:$0xff] %v1544_v42  ;;  %v1547_v46 = vadd.f32 %v2052_v45, %v1762_v40  ;;  %v1538_v47 = vpop.f32.mrb[35].mxu1 }
 0x62c   : > { %1598 = vst [vmem:[%s2697_s9] sm:$0xff] %v1536_v44  ;;  %v1539_v48 = vadd.f32 %v1762_v40, %v1538_v47 }
 0x62d   : > { %1601 = vst [vmem:[%s2697_s9 + $0x18] sm:$0xff] %v1547_v46 }
 0x62e   : > { %1599 = vst [vmem:[%s2697_s9 + $0x8] sm:$0xff] %v1539_v48 }
 0x630   : > { %v2055_v49 = vpop.f32.mrb[36].mxu1 }
 0x631   : > { %v1560_v50 = vadd.f32 %v2055_v49, %v1762_v40  ;;  %v1551_v51 = vpop.f32.mrb[37].mxu1 }
 0x632   : > { %v1552_v52 = vadd.f32 %v1762_v40, %v1551_v51  ;;  %v2056_v53 = vpop.f32.mrb[38].mxu1 }
 0x633   : > { %1604 = vst [vmem:[%s2697_s9 + $0x30] sm:$0xff] %v1560_v50  ;;  %v1563_v54 = vadd.f32 %v2056_v53, %v1762_v40  ;;  %v1554_v55 = vpop.f32.mrb[39].mxu1 }
 0x634   : > { %1602 = vst [vmem:[%s2697_s9 + $0x20] sm:$0xff] %v1552_v52  ;;  %v1555_v56 = vadd.f32 %v1762_v40, %v1554_v55 }
 0x635   : > { %1605 = vst [vmem:[%s2697_s9 + $0x38] sm:$0xff] %v1563_v54 }
 0x636   : > { %1603 = vst [vmem:[%s2697_s9 + $0x28] sm:$0xff] %v1555_v56 }
 0x638   : > { %v2059_v57 = vpop.f32.mrb[40].mxu1 }
 0x639   : > { %v1576_v58 = vadd.f32 %v2059_v57, %v1762_v40  ;;  %v1567_v59 = vpop.f32.mrb[41].mxu1 }
 0x63a   : > { %v1568_v60 = vadd.f32 %v1762_v40, %v1567_v59  ;;  %v2060_v61 = vpop.f32.mrb[42].mxu1 }
 0x63b   : > { %1608 = vst [vmem:[%s2697_s9 + $0x50] sm:$0xff] %v1576_v58  ;;  %v1579_v62 = vadd.f32 %v2060_v61, %v1762_v40  ;;  %v1570_v63 = vpop.f32.mrb[43].mxu1 }
 0x63c   : > { %1606 = vst [vmem:[%s2697_s9 + $0x40] sm:$0xff] %v1568_v60  ;;  %v1571_v0 = vadd.f32 %v1762_v40, %v1570_v63 }
 0x63d   : > { %1609 = vst [vmem:[%s2697_s9 + $0x58] sm:$0xff] %v1579_v62 }
 0x63e   : > { %1607 = vst [vmem:[%s2697_s9 + $0x48] sm:$0xff] %v1571_v0 }
 0x640   : > { %v2063_v1 = vpop.f32.mrb[44].mxu1 }
 0x641   : > { %v1592_v2 = vadd.f32 %v2063_v1, %v1762_v40  ;;  %v1583_v3 = vpop.f32.mrb[45].mxu1 }
 0x642   : > { %v1584_v4 = vadd.f32 %v1762_v40, %v1583_v3  ;;  %v2064_v5 = vpop.f32.mrb[46].mxu1 }
 0x643   : > { %1612 = vst [vmem:[%s2697_s9 + $0x70] sm:$0xff] %v1592_v2  ;;  %v1595_v6 = vadd.f32 %v2064_v5, %v1762_v40  ;;  %v1586_v7 = vpop.f32.mrb[47].mxu1 }
 0x644   : > { %1610 = vst [vmem:[%s2697_s9 + $0x60] sm:$0xff] %v1584_v4  ;;  %v1587_v8 = vadd.f32 %v1762_v40, %v1586_v7 }
 0x645   : > { %1613 = vst [vmem:[%s2697_s9 + $0x78] sm:$0xff] %v1595_v6 }
 0x646   : > { %1611 = vst [vmem:[%s2697_s9 + $0x68] sm:$0xff] %v1587_v8 }
 0x647   : > { %2403 = shalt.err (!%p2400_p7)
}
 0x648   : > { %s2404_s22 = scalar_lea.hbm %s2717_s19, 2048  ;;  %s2408_s8 = scalar_lea.hbm %s2774_s7, 4096 }
 0x649   : > { %p2405_p8 = scmp.ne.s32.totalorder %s2717_s19, %s2404_s22  ;;  %p2409_p1 = scmp.lt.u32.totalorder %s2717_s19, %s2774_s7 }
 0x64a   : > { %p2410_p0 = scmp.lt.u32.totalorder %s2408_s8, %s2404_s22  ;;  %p2412_p6 = scmp.lt.u32.totalorder %s2404_s22, %s2717_s19 }
 0x64b   : > { %p2406_p11 = pnand %p2405_p8, %p2785_p9 }
 0x64c   : > { %p2411_p5 = por %p2410_p0, %p2409_p1 }
 0x64d   : > { %p2407_p13 = pneg %p2406_p11 }
 0x64e   : > { %p2413_p10 = por %p2412_p6, %p2411_p5 }
 0x650   : > { %p2414_p12 = pnand %p2413_p10, %p2407_p13 }
 0x652   : > { %2417 = shalt.err (!%p2414_p12)
}
 0x653   : > { %s2463_s18 = smov 128   ;;  %s2464_s16 = smov 8  }
 0x654   : > { %2069 = dma.vmem_to_hbm [thread:$0]  (%p2785_p9), %s2719_s17, 2048, %s2717_s19, %s2726_s28, %s2463_s18, %s2463_s18, %s2464_s16  }
 0x655 PF: > { %p2081_p2 = scmp.ge.s32.totalorder %s2456_s27, 2  ;;  %s1643_s20 = sand.u32 1, %s2444_s24  }
 0x656   : > { %p2786_p3 = scmp.ne.s32.totalorder %s2779_s12, 0  ;;  %s1644_s15 = scalar_lea.sflag [#allocation4], %s1643_s20 }
 0x658   : > { %p2076_p4 = pnand %p2081_p2, %p2786_p3 }
 0x65a   : > { %2439 = dma.done.wait (!%p2076_p4), %s1644_s15, 2048  }
 0x65b   : > { %2441 = vsyncadd (!%p2076_p4), %s1644_s15, 4294965248  ;;  %p18_p7 = scmp.ge.s32.totalorder %s2530_s30, 4   ;;  %s2787_s24 = smov %s2448_s25 }
 0x65c   : > { %s2788_s25 = smov %s2452_s26  ;;  %s2789_s26 = smov %s2541_s10 }
 0x65d   : > { %s2790_s27 = smov %s2530_s30  ;;  %20 = sbr.rel (!%p18_p7) target bundleno = 4 (0x4), region = 96 }
 0x664   :  { %1649 = vsyncpa [#allocation3], 1 }
 0x665   :  { %1651 = vsyncpa [#allocation3 + $0x1], 1 }
 0x666   :  { %1652 = vsyncpa [#allocation4], 1 }
 0x667   :  { %1654 = vsyncpa [#allocation4 + $0x1], 1 }

// kernel: _net_forward_padded.1
= control target key start
LH: loop header
LB: loop body
LE: loop exit
PB: predicated region body
PF: predicated region fallthrough
CT: control target
= control target key end

     0   :  { %12 = vsyncpa [#allocation3], 0  ;;  %s2767_s0 = inlined_call_operand.vmem [shape: f32[256,1], index: 0, kind: input, shape index: {}]   ;;  %s2768_s1 = inlined_call_operand.vmem [shape: f32[1,128], index: 1, kind: input, shape index: {}]   ;;  %s2769_s2 = inlined_call_operand.vmem [shape: f32[1,128], index: 2, kind: input, shape index: {}]   ;;  %s2770_s3 = inlined_call_operand.hbm [shape: bf16[5,128,128], index: 3, kind: input, shape index: {}]   ;;  %s2771_s4 = inlined_call_operand.vmem [shape: f32[5,1,128], index: 4, kind: input, shape index: {}]   ;;  %s2772_s5 = inlined_call_operand.vmem [shape: bf16[128,128], index: 5, kind: input, shape index: {}]   ;;  %s2773_s6 = inlined_call_operand.vmem [shape: f32[1,128], index: 6, kind: input, shape index: {}]   ;;  %s2774_s7 = inlined_call_operand.hbm [shape: f32[256,128], index: 7, kind: output, shape index: {}]  }
   0x1   :  { %13 = vsyncpa [#allocation4], 0 }
   0x2   :  { %15 = vsyncpa [#allocation4 + $0x1], 0  ;;  %s2505_s24 = smov 0   ;;  %s2507_s25 = smov 0  }
   0x3   :  { %s2509_s26 = smov 0   ;;  %s2511_s27 = smov 0  }
   0x4 LB: > { %s2526_s28 = sadd.s32 4294967295, %s2456_s27   ;;  %s1702_s29 = sadd.s32 4294967294, %s2456_s27   ;;  %s2456_s27 = sphi %s2511_s27, %s2790_s27   ;;  %s2452_s26 = sphi %s2509_s26, %s2789_s26   ;;  %s2448_s25 = sphi %s2507_s25, %s2788_s25   ;;  %s2444_s24 = sphi %s2505_s24, %s2787_s24  }
   0x5   : > { %s2530_s30 = sadd.s32 1, %s2456_s27   ;;  %s180_s8 = sadd.s32 1, %s2452_s26 }
   0x6   : > { %s177_s9 = ssub.s32 %s2456_s27, %s2530_s30  ;;  %p190_p0 = scmp.ne.s32.totalorder %s2452_s26, %s2448_s25 }
   0x7   : > { %p178_p1 = scmp.eq.s32.totalorder %s177_s9, 0  ;;  %p191_p2 = scmp.eq.s32.totalorder %s2526_s28, 1 }
   0x8   : > { %p196_p3 = scmp.ne.s32.totalorder %s2448_s25, %s2444_s24  ;;  %p197_p4 = scmp.eq.s32.totalorder %s1702_s29, 1 }
   0x9   : > { %s2541_s10 = scalar_select %p178_p1, %s2452_s26, %s180_s8  }
   0xa   : > { %p2543_p5 = por %p191_p2, %p190_p0  ;;  %p2547_p6 = por %p197_p4, %p196_p3 }
   0xb   : > { %p1703_p7 = scmp.ge.s32.totalorder %s2456_s27, 1  ;;  %p204_p8 = scmp.lt.s32.totalorder %s2456_s27, 3 }
   0xc   : > { %s2778_s11 = scalar_select %p2543_p5, 1, 0 }
   0xd   : > { %s2779_s12 = scalar_select %p2547_p6, 1, 0 }
   0xe   : > { %p2775_p9 = scmp.eq.s32.totalorder %s2526_s28, 0  ;;  %p2554_p10 = pnand %p1703_p7, %p204_p8 }
   0xf   : > { %s2458_s14 = smov [#allocation2]   ;;  %s2362_s19 = scalar_lea.hbm %s2770_s3, 5120 }
  0x10   : > { %s2780_s13 = scalar_select %p2554_p10, 1, 0 }
  0x11   : > { %s222_s15 = sshll.u32 %s2458_s14, 4  ;;  %p2071_p11 = pneg %p2554_p10  ;;  %s223_s15 = int_to_ptr.vmem [resolvable:$true] %s222_s15 }
  0x12   : > { %p2363_p13 = scmp.ne.s32.totalorder %s2770_s3, %s2362_s19  ;;  %p2369_p3 = scmp.lt.u32.totalorder %s2362_s19, %s2770_s3 }
  0x13   : > { %p2562_p12 = pnand %p2775_p9, %p2071_p11 }
  0x15   : > { %p2364_p0 = pneg %p2562_p12 }
  0x17   : > { %p2365_p1 = pnand %p2364_p0, %p2363_p13 }
  0x19   : > { %p2366_p2 = pneg %p2365_p1 }
  0x1b   : > { %p2371_p4 = pnand %p2369_p3, %p2366_p2 }
  0x1d   : > { %2374 = shalt.err (!%p2371_p4)
}
  0x1e   : > { %s2375_s29 = scalar_lea.vmem %s223_s15, 5120  ;;  %p2383_p9 = scmp.lt.s32.totalorder %s223_s15, %s223_s15 }
  0x1f   : > { %p2376_p7 = scmp.ne.s32.totalorder %s223_s15, %s2375_s29  ;;  %p2384_p6 = scmp.lt.s32.totalorder %s2375_s29, %s2375_s29 }
  0x21   : > { %p2378_p8 = pnand %p2376_p7, %p2364_p0  ;;  %p2385_p5 = por %p2384_p6, %p2383_p9 }
  0x23   : > { %p2379_p11 = pneg %p2378_p8 }
  0x25   : > { %p2386_p10 = pnand %p2385_p5, %p2379_p11 }
  0x27   : > { %2389 = shalt.err (!%p2386_p10)
}
  0x28   : > { %s2459_s8 = smov 64   ;;  %s2460_s9 = smov 4  }
  0x29   : > { %2074 = dma.hbm_to_vmem [thread:$0]  (!%p2562_p12), %s2770_s3, 5120, %s223_s15, [#allocation3], %s2459_s8, %s2459_s8, %s2460_s9  }
  0x2a   : > { %p2782_p13 = scmp.ne.s32.totalorder %s2780_s13, 0 }
  0x2b   : > { %p2783_p1 = scmp.eq.s32.totalorder (!%p2782_p13), %s2526_s28, 0 }
  0x2c   : > { %256 = sbr.rel (%p2782_p13) target bundleno = 1621 (0x655), region = 48 }
  0x33   : > { %2435 = dma.done.wait (%p2783_p1), [#allocation3], 5120   ;;  %p2784_p0 = pmov %p2783_p1 }
  0x34   : > { %s1709_s18 = sshll.u32 %s2526_s28, 4  ;;  %v2461_v0 = vmov 0   ;;  %v2122_v7 = vld [vmem:[#allocation2] sm:$0xff]   ;;  %v2123_v8 = vld [vmem:[#allocation2 + $0x8] sm:$0xff]   ;;  %v2124_v11 = vld [vmem:[#allocation2 + $0x10] sm:$0xff]   ;;  %s285_s22 = sand.u32 1, %s2448_s25  }
  0x35   : > { %2437 = vsyncadd (%p2784_p0), [#allocation3], 4294962176  ;;  %2121 = vset.pattern.permute.xlu1 %v2461_v0  ;;  %2120 = vset.pattern.permute.xlu0 %v2461_v0  ;;  %p289_p5 = scmp.lt.s32.totalorder %s1709_s18, 31  ;;  %v2125_v14 = vld [vmem:[#allocation2 + $0x18] sm:$0xff]   ;;  %v2126_v17 = vld [vmem:[#allocation2 + $0x20] sm:$0xff]   ;;  %s1708_s23 = sshll.u32 %s285_s22, 7 }
  0x36   : > { %1873 = vmatprep.subr.bf16.mxu0 %v2122_v7  ;;  %v2127_v20 = vld [vmem:[#allocation2 + $0x28] sm:$0xff]   ;;  %v2128_v23 = vld [vmem:[#allocation2 + $0x30] sm:$0xff]   ;;  %v2129_v24 = vld [vmem:[#allocation2 + $0x38] sm:$0xff]   ;;  %s2697_s9 = scalar_lea.vmem [#allocation5], %s1708_s23  ;;  %s1776_s14 = sshll.u32 %s2526_s28, 11 }
  0x37   : > { %s2792_s18 = smov (!%p289_p5, %s1709_s18), 31  ;;  %1874 = vmatpush3.bf16.msra.mxu0 %v2122_v7  ;;  %v2130_v25 = vld [vmem:[#allocation2 + $0x40] sm:$0xff]   ;;  %v2131_v26 = vld [vmem:[#allocation2 + $0x48] sm:$0xff]   ;;  %v2132_v27 = vld [vmem:[#allocation2 + $0x50] sm:$0xff]   ;;  %s1628_s17 = sshll.u32 %s2697_s9, 4  ;;  %s2719_s17 = int_to_ptr.vmem [resolvable:$true] %s1628_s17 }
  0x38   : > { %s1710_s16 = sshll.u32 %s2792_s18, 3  ;;  %1875 = vmatprep.subr.bf16.mxu0 %v2123_v8  ;;  %1905 = vmatprep.subr.bf16.mxu1 %v2130_v25  ;;  %v2613_v28 = vld [vmem:[%s2768_s1] ss:$0 sm:$0xff]  ;;  %s2717_s19 = scalar_lea.hbm %s2774_s7, %s1776_s14 }
  0x39   : > { %s2592_s15 = scalar_lea.vmem %s2767_s0, %s1710_s16  ;;  %1906 = vmatpush3.bf16.msra.mxu1 %v2130_v25  ;;  %v2618_v29 = vld [vmem:[%s2769_s2] ss:$0 sm:$0xff]  ;;  %s2726_s28 = scalar_lea.sflag [#allocation4], %s285_s22 }
  0x3a   : > { %v298_v1 = vld [vmem:[%s2592_s15 + $0x10] sm:$0xff]  ;;  %v296_v2 = vld [vmem:[%s2592_s15] sm:$0xff]  ;;  %v299_v3 = vld [vmem:[%s2592_s15 + $0x18] sm:$0xff]  ;;  %1907 = vmatprep.subr.bf16.mxu1 %v2131_v26  ;;  %s2390_s20 = scalar_lea.vmem %s2719_s17, 2048  ;;  %p2785_p9 = scmp.ne.s32.totalorder %s2778_s11, 0 }
  0x3b   : > { %325 = vperm.xlu1 %2121, %v298_v1   ;;  %315 = vperm.xlu0 %2120, %v296_v2   ;;  %v297_v4 = vld [vmem:[%s2592_s15 + $0x8] sm:$0xff]  ;;  %v300_v6 = vld [vmem:[%s2592_s15 + $0x20] sm:$0xff]  ;;  %v303_v9 = vld [vmem:[%s2592_s15 + $0x38] sm:$0xff]  ;;  %p2391_p6 = scmp.ne.s32.totalorder %s2719_s17, %s2390_s20 }
  0x3c   : > { %v301_v5 = vld [vmem:[%s2592_s15 + $0x28] sm:$0xff]  ;;  %v302_v10 = vld [vmem:[%s2592_s15 + $0x30] sm:$0xff]  ;;  %v304_v13 = vld [vmem:[%s2592_s15 + $0x40] sm:$0xff]  ;;  %1876 = vmatpush3.bf16.msra.mxu0 %v2123_v8 }
  0x3d   : > { %v305_v12 = vld [vmem:[%s2592_s15 + $0x48] sm:$0xff]  ;;  %1877 = vmatprep.subr.bf16.mxu0 %v2124_v11  ;;  %v307_v15 = vld [vmem:[%s2592_s15 + $0x58] sm:$0xff]  ;;  %v306_v16 = vld [vmem:[%s2592_s15 + $0x50] sm:$0xff]  ;;  %1908 = vmatpush3.bf16.msra.mxu1 %v2131_v26  ;;  %p2392_p10 = pnand %p2391_p6, %p2785_p9 }
  0x3e   : > { %v309_v18 = vld [vmem:[%s2592_s15 + $0x68] sm:$0xff]  ;;  %v308_v19 = vld [vmem:[%s2592_s15 + $0x60] sm:$0xff]  ;;  %v311_v21 = vld [vmem:[%s2592_s15 + $0x78] sm:$0xff]  ;;  %1909 = vmatprep.subr.bf16.mxu1 %v2132_v27 }
  0x3f   : > { %330 = vperm.xlu1 %2121, %v299_v3   ;;  %320 = vperm.xlu0 %2120, %v297_v4   ;;  %v310_v22 = vld [vmem:[%s2592_s15 + $0x70] sm:$0xff]  ;;  %p2393_p12 = pneg %p2392_p10  ;;  %s2462_s15 = smov [#allocation5]  }
  0x40   : > { %1878 = vmatpush3.bf16.msra.mxu0 %v2124_v11  ;;  %s2394_s13 = sshll.u32 %s2462_s15, 4  ;;  %s2395_s13 = int_to_ptr.vmem [resolvable:$false] %s2394_s13 }
  0x41   : > { %1879 = vmatprep.subr.bf16.mxu0 %v2125_v14  ;;  %1910 = vmatpush3.bf16.msra.mxu1 %v2132_v27  ;;  %s2396_s21 = scalar_lea.vmem %s2395_s13, 4096  ;;  %p2397_p2 = scmp.lt.s32.totalorder %s2719_s17, %s2395_s13 }
  0x42   : > { %p2398_p3 = scmp.lt.s32.totalorder %s2396_s21, %s2390_s20 }
  0x43   : > { %340 = vperm.xlu1 %2121, %v301_v5   ;;  %335 = vperm.xlu0 %2120, %v300_v6  }
  0x44   : > { %1880 = vmatpush3.bf16.msra.mxu0 %v2125_v14  ;;  %p2399_p4 = por %p2398_p3, %p2397_p2 }
  0x45   : > { %1881 = vmatprep.subr.bf16.mxu0 %v2126_v17 }
  0x46   : > { %p2400_p7 = pnand %p2399_p4, %p2393_p12 }
  0x47   : > { %350 = vperm.xlu1 %2121, %v303_v9   ;;  %345 = vperm.xlu0 %2120, %v302_v10  }
  0x48   : > { %1882 = vmatpush3.bf16.msra.mxu0 %v2126_v17 }
  0x49   : > { %1883 = vmatprep.subr.bf16.mxu0 %v2127_v20 }
  0x4b   : > { %360 = vperm.xlu1 %2121, %v305_v12   ;;  %355 = vperm.xlu0 %2120, %v304_v13  }
  0x4c   : > { %1884 = vmatpush3.bf16.msra.mxu0 %v2127_v20 }
  0x4d   : > { %1885 = vmatprep.subr.bf16.mxu0 %v2128_v23 }
  0x4f   : > { %370 = vperm.xlu1 %2121, %v307_v15   ;;  %365 = vperm.xlu0 %2120, %v306_v16  }
  0x50   : > { %1886 = vmatpush3.bf16.msra.mxu0 %v2128_v23 }
  0x51   : > { %1887 = vmatprep.subr.bf16.mxu0 %v2129_v24 }
  0x53   : > { %380 = vperm.xlu1 %2121, %v309_v18   ;;  %375 = vperm.xlu0 %2120, %v308_v19  }
  0x54   : > { %1888 = vmatpush3.bf16.msra.mxu0 %v2129_v24 }
  0x57   : > { %390 = vperm.xlu1 %2121, %v311_v21   ;;  %385 = vperm.xlu0 %2120, %v310_v22  }
  0xba   : > { %v326_v30 = vpop.permute.xlu1 %325  ;;  %v316_v31 = vpop.permute.xlu0 %315 }
  0xbb   : > { %v401_v32 = vmul.f32 %v2613_v28, %v326_v30  ;;  %v399_v33 = vmul.f32 %v2613_v28, %v316_v31 }
  0xbd   : > { %v424_v34 = vadd.f32 %v2618_v29, %v401_v32  ;;  %v422_v35 = vadd.f32 %v2618_v29, %v399_v33 }
  0xbe   : > { %v331_v36 = vpop.permute.xlu1 %330  ;;  %v321_v37 = vpop.permute.xlu0 %320 }
  0xbf   : > { %v402_v38 = vmul.f32 %v2613_v28, %v331_v36  ;;  %v400_v39 = vmul.f32 %v2613_v28, %v321_v37  ;;  %2170 = vtanh.f32 %v424_v34 }
  0xc0   : > { %2172 = vtanh.f32 %v422_v35 }
  0xc1   : > { %v425_v40 = vadd.f32 %v2618_v29, %v402_v38  ;;  %v423_v41 = vadd.f32 %v2618_v29, %v400_v39  ;;  %v2133_v39 = vld [vmem:[#allocation2 + $0x58] sm:$0xff]  }
  0xc2   : > { %v341_v42 = vpop.permute.xlu1 %340  ;;  %v336_v43 = vpop.permute.xlu0 %335  ;;  %1911 = vmatprep.subr.bf16.mxu1 %v2133_v39 }
  0xc3   : > { %2174 = vtanh.f32 %v425_v40  ;;  %v404_v44 = vmul.f32 %v2613_v28, %v341_v42  ;;  %v403_v45 = vmul.f32 %v2613_v28, %v336_v43  ;;  %1912 = vmatpush3.bf16.msra.mxu1 %v2133_v39  ;;  %v2135_v40 = vld [vmem:[#allocation2 + $0x68] sm:$0xff]   ;;  %v2137_v42 = vld [vmem:[#allocation2 + $0x78] sm:$0xff]   ;;  %v2138_v43 = vld [vmem:[#allocation2 + $0x80] sm:$0xff]  }
  0xc4   : > { %2176 = vtanh.f32 %v423_v41  ;;  %v2136_v41 = vld [vmem:[#allocation2 + $0x70] sm:$0xff]   ;;  %1937 = vmatprep.subr.bf16.mxu0 %v2138_v43 }
  0xc5   : > { %v427_v46 = vadd.f32 %v2618_v29, %v404_v44  ;;  %v426_v47 = vadd.f32 %v2618_v29, %v403_v45  ;;  %v2139_v44 = vld [vmem:[#allocation2 + $0x88] sm:$0xff]   ;;  %v2140_v45 = vld [vmem:[#allocation2 + $0x90] sm:$0xff]  }
  0xc6   : > { %v351_v48 = vpop.permute.xlu1 %350  ;;  %v346_v49 = vpop.permute.xlu0 %345 }
  0xc7   : > { %2178 = vtanh.f32 %v427_v46  ;;  %v406_v50 = vmul.f32 %v2613_v28, %v351_v48  ;;  %v405_v51 = vmul.f32 %v2613_v28, %v346_v49  ;;  %v2141_v46 = vld [vmem:[#allocation2 + $0x98] sm:$0xff]  }
  0xc8   : > { %2180 = vtanh.f32 %v426_v47  ;;  %v1713_v47 = vld [vmem:[%s2771_s4] ss:$0 sm:$0xff] }
  0xc9   : > { %v429_v52 = vadd.f32 %v2618_v29, %v406_v50  ;;  %v428_v53 = vadd.f32 %v2618_v29, %v405_v51  ;;  %v2171_v56 = vpop.eup %2170 }
  0xca   : > { %v361_v54 = vpop.permute.xlu1 %360  ;;  %v356_v55 = vpop.permute.xlu0 %355 }
  0xcb   : > { %2182 = vtanh.f32 %v429_v52  ;;  %v408_v57 = vmul.f32 %v2613_v28, %v361_v54  ;;  %v407_v58 = vmul.f32 %v2613_v28, %v356_v55  ;;  %v2173_v59 = vpop.eup %2172 }
  0xcc   : > { %2184 = vtanh.f32 %v428_v53 }
  0xcd   : > { %v2175_v60 = vpop.eup %2174  ;;  %v431_v61 = vadd.f32 %v2618_v29, %v408_v57  ;;  %v430_v62 = vadd.f32 %v2618_v29, %v407_v58 }
  0xce   : > { %v2177_v63 = vpop.eup %2176  ;;  %v371_v0 = vpop.permute.xlu1 %370  ;;  %v455_v2 = vpack.c.bf16 %v2175_v60, %v2171_v56 }
  0xcf   : > { %v366_v1 = vpop.permute.xlu0 %365  ;;  %2186 = vtanh.f32 %v431_v61  ;;  %v410_v3 = vmul.f32 %v2613_v28, %v371_v0  ;;  %v454_v5 = vpack.c.bf16 %v2177_v63, %v2173_v59 }
  0xd0   : > { %v409_v4 = vmul.f32 %v2613_v28, %v366_v1  ;;  %2188 = vtanh.f32 %v430_v62 }
  0xd1   : > { %v2179_v6 = vpop.eup %2178  ;;  %v433_v7 = vadd.f32 %v2618_v29, %v410_v3  ;;  %1889 = vmatprep.mubr.bf16.mxu0 %v454_v5 }
  0xd2   : > { %v432_v8 = vadd.f32 %v2618_v29, %v409_v4  ;;  %v2181_v9 = vpop.eup %2180  ;;  %1890 = vmatmul.mubr.bf16.vlgmr.msra.gmra.mrb[0].mxu0 %v455_v2  ;;  %v381_v10 = vpop.permute.xlu1 %380 }
  0xd3   : > { %v376_v11 = vpop.permute.xlu0 %375  ;;  %2190 = vtanh.f32 %v433_v7  ;;  %v412_v12 = vmul.f32 %v2613_v28, %v381_v10  ;;  %v456_v14 = vpack.c.bf16 %v2179_v6, %v2181_v9  ;;  %1938 = vmatpush3.bf16.msra.mxu0 %v2138_v43  ;;  %v2145_v43 = vld [vmem:[#allocation2 + $0xb8] sm:$0xff]  }
  0xd4   : > { %v411_v13 = vmul.f32 %v2613_v28, %v376_v11  ;;  %2192 = vtanh.f32 %v432_v8  ;;  %1939 = vmatprep.subr.bf16.mxu0 %v2139_v44 }
  0xd5   : > { %v2183_v15 = vpop.eup %2182  ;;  %v435_v16 = vadd.f32 %v2618_v29, %v412_v12  ;;  %1893 = vmatprep.mubr.bf16.mxu0 %v456_v14 }
  0xd6   : > { %v434_v17 = vadd.f32 %v2618_v29, %v411_v13  ;;  %v2185_v18 = vpop.eup %2184  ;;  %v391_v19 = vpop.permute.xlu1 %390 }
  0xd7   : > { %v386_v20 = vpop.permute.xlu0 %385  ;;  %2194 = vtanh.f32 %v435_v16  ;;  %v414_v21 = vmul.f32 %v2613_v28, %v391_v19  ;;  %v457_v23 = vpack.c.bf16 %v2183_v15, %v2185_v18  ;;  %1940 = vmatpush3.bf16.msra.mxu0 %v2139_v44  ;;  %v2146_v44 = vld [vmem:[#allocation2 + $0xc0] sm:$0xff]  }
  0xd8   : > { %v413_v22 = vmul.f32 %v2613_v28, %v386_v20  ;;  %2196 = vtanh.f32 %v434_v17  ;;  %1941 = vmatprep.subr.bf16.mxu0 %v2140_v45 }
  0xd9   : > { %v2187_v24 = vpop.eup %2186  ;;  %v437_v25 = vadd.f32 %v2618_v29, %v414_v21 }
  0xda   : > { %v436_v26 = vadd.f32 %v2618_v29, %v413_v22  ;;  %v2189_v27 = vpop.eup %2188  ;;  %1894 = vmatmul.mubr.bf16.gmra.mrb[4].mxu0 %v457_v23  ;;  %v2134_v29 = vld [vmem:[#allocation2 + $0x60] sm:$0xff]  }
  0xdb   : > { %2198 = vtanh.f32 %v437_v25  ;;  %v458_v30 = vpack.c.bf16 %v2187_v24, %v2189_v27  ;;  %1913 = vmatprep.subr.bf16.mxu1 %v2134_v29  ;;  %1942 = vmatpush3.bf16.msra.mxu0 %v2140_v45  ;;  %v2147_v45 = vld [vmem:[#allocation2 + $0xc8] sm:$0xff]  }
  0xdc   : > { %2200 = vtanh.f32 %v436_v26  ;;  %1914 = vmatpush3.bf16.msra.mxu1 %v2134_v29  ;;  %1943 = vmatprep.subr.bf16.mxu0 %v2141_v46 }
  0xdd   : > { %v2191_v31 = vpop.eup %2190  ;;  %1897 = vmatprep.mubr.bf16.mxu0 %v458_v30  ;;  %1915 = vmatprep.subr.bf16.mxu1 %v2135_v40 }
  0xde   : > { %v2193_v32 = vpop.eup %2192 }
  0xdf   : > { %v459_v33 = vpack.c.bf16 %v2191_v31, %v2193_v32  ;;  %1944 = vmatpush3.bf16.msra.mxu0 %v2141_v46  ;;  %v2148_v46 = vld [vmem:[#allocation2 + $0xd0] sm:$0xff]  }
  0xe0   : > { %1916 = vmatpush3.bf16.msra.mxu1 %v2135_v40  ;;  %v2142_v40 = vld [vmem:[#allocation2 + $0xa0] sm:$0xff]  }
  0xe1   : > { %v2195_v34 = vpop.eup %2194  ;;  %1917 = vmatprep.subr.bf16.mxu1 %v2136_v41  ;;  %1945 = vmatprep.subr.bf16.mxu0 %v2142_v40 }
  0xe2   : > { %v2197_v35 = vpop.eup %2196  ;;  %1898 = vmatmul.mubr.bf16.gmra.mrb[8].mxu0 %v459_v33 }
  0xe3   : > { %v460_v28 = vpack.c.bf16 %v2195_v34, %v2197_v35  ;;  %1946 = vmatpush3.bf16.msra.mxu0 %v2142_v40 }
  0xe4   : > { %1918 = vmatpush3.bf16.msra.mxu1 %v2136_v41  ;;  %v2143_v41 = vld [vmem:[#allocation2 + $0xa8] sm:$0xff]  }
  0xe5   : > { %v2199_v36 = vpop.eup %2198  ;;  %1901 = vmatprep.mubr.bf16.mxu0 %v460_v28  ;;  %1919 = vmatprep.subr.bf16.mxu1 %v2137_v42 }
  0xe6   : > { %v2201_v37 = vpop.eup %2200  ;;  %1947 = vmatprep.subr.bf16.mxu0 %v2143_v41 }
  0xe7   : > { %v461_v38 = vpack.c.bf16 %v2199_v36, %v2201_v37  ;;  %1948 = vmatpush3.bf16.msra.mxu0 %v2143_v41  ;;  %v2150_v41 = vld [vmem:[#allocation2 + $0xe0] sm:$0xff]  }
  0xe8   : > { %1920 = vmatpush3.bf16.msra.mxu1 %v2137_v42  ;;  %v2144_v42 = vld [vmem:[#allocation2 + $0xb0] sm:$0xff]  }
  0xe9   : > { %1949 = vmatprep.subr.bf16.mxu0 %v2144_v42  ;;  %1969 = vmatprep.subr.bf16.mxu1 %v2146_v44 }
  0xea   : > { %1902 = vmatmul.mubr.bf16.gmra.mrb[12].mxu0 %v461_v38 }
  0xeb   : > { %1950 = vmatpush3.bf16.msra.mxu0 %v2144_v42  ;;  %v2151_v42 = vld [vmem:[#allocation2 + $0xe8] sm:$0xff]  }
  0xec   : > { %1951 = vmatprep.subr.bf16.mxu0 %v2145_v43 }
  0xef   : > { %1952 = vmatpush3.bf16.msra.mxu0 %v2145_v43  ;;  %v2152_v43 = vld [vmem:[#allocation2 + $0xf0] sm:$0xff]  }
 0x1a5   : > { %v1891_v48 = vpop.f32.mrb[0].mxu0 }
 0x1a6   : > { %v576_v49 = vadd.f32 %v1891_v48, %v1713_v47  ;;  %v567_v50 = vpop.f32.mrb[1].mxu0  ;;  %v1723_v48 = vld [vmem:[%s2771_s4 + $0x1] ss:$0 sm:$0xff] }
 0x1a7   : > { %v568_v51 = vadd.f32 %v1713_v47, %v567_v50  ;;  %v1892_v52 = vpop.f32.mrb[2].mxu0 }
 0x1a8   : > { %2202 = vtanh.f32 %v576_v49  ;;  %v579_v53 = vadd.f32 %v1892_v52, %v1713_v47  ;;  %v570_v54 = vpop.f32.mrb[3].mxu0 }
 0x1a9   : > { %2204 = vtanh.f32 %v568_v51  ;;  %v571_v55 = vadd.f32 %v1713_v47, %v570_v54 }
 0x1aa   : > { %2206 = vtanh.f32 %v579_v53 }
 0x1ab   : > { %2208 = vtanh.f32 %v571_v55 }
 0x1ad   : > { %v1895_v56 = vpop.f32.mrb[4].mxu0 }
 0x1ae   : > { %v592_v57 = vadd.f32 %v1895_v56, %v1713_v47  ;;  %v583_v58 = vpop.f32.mrb[5].mxu0 }
 0x1af   : > { %v584_v59 = vadd.f32 %v1713_v47, %v583_v58  ;;  %v1896_v60 = vpop.f32.mrb[6].mxu0 }
 0x1b0   : > { %2210 = vtanh.f32 %v592_v57  ;;  %v595_v61 = vadd.f32 %v1896_v60, %v1713_v47  ;;  %v586_v62 = vpop.f32.mrb[7].mxu0 }
 0x1b1   : > { %2212 = vtanh.f32 %v584_v59  ;;  %v587_v63 = vadd.f32 %v1713_v47, %v586_v62 }
 0x1b2   : > { %v2203_v0 = vpop.eup %2202  ;;  %2214 = vtanh.f32 %v595_v61 }
 0x1b3   : > { %v2205_v1 = vpop.eup %2204  ;;  %2216 = vtanh.f32 %v587_v63 }
 0x1b4   : > { %v2207_v2 = vpop.eup %2206 }
 0x1b5   : > { %v2209_v3 = vpop.eup %2208  ;;  %v1899_v4 = vpop.f32.mrb[8].mxu0  ;;  %v647_v5 = vpack.c.bf16 %v2207_v2, %v2203_v0 }
 0x1b6   : > { %v608_v6 = vadd.f32 %v1899_v4, %v1713_v47  ;;  %v599_v7 = vpop.f32.mrb[9].mxu0  ;;  %v646_v8 = vpack.c.bf16 %v2209_v3, %v2205_v1 }
 0x1b7   : > { %v600_v9 = vadd.f32 %v1713_v47, %v599_v7  ;;  %v1900_v10 = vpop.f32.mrb[10].mxu0 }
 0x1b8   : > { %2218 = vtanh.f32 %v608_v6  ;;  %v611_v11 = vadd.f32 %v1900_v10, %v1713_v47  ;;  %v602_v12 = vpop.f32.mrb[11].mxu0  ;;  %1921 = vmatprep.mubr.bf16.mxu1 %v646_v8 }
 0x1b9   : > { %2220 = vtanh.f32 %v600_v9  ;;  %v603_v13 = vadd.f32 %v1713_v47, %v602_v12  ;;  %1922 = vmatmul.mubr.bf16.vlgmr.msra.gmra.mrb[0].mxu1 %v647_v5 }
 0x1ba   : > { %v2211_v14 = vpop.eup %2210  ;;  %2222 = vtanh.f32 %v611_v11  ;;  %1970 = vmatpush3.bf16.msra.mxu1 %v2146_v44  ;;  %v2153_v44 = vld [vmem:[#allocation2 + $0xf8] sm:$0xff]  }
 0x1bb   : > { %v2213_v15 = vpop.eup %2212  ;;  %2224 = vtanh.f32 %v603_v13  ;;  %1971 = vmatprep.subr.bf16.mxu1 %v2147_v45 }
 0x1bc   : > { %v2215_v16 = vpop.eup %2214 }
 0x1bd   : > { %v2217_v17 = vpop.eup %2216  ;;  %v1903_v18 = vpop.f32.mrb[12].mxu0  ;;  %v649_v19 = vpack.c.bf16 %v2215_v16, %v2211_v14 }
 0x1be   : > { %v624_v20 = vadd.f32 %v1903_v18, %v1713_v47  ;;  %v615_v21 = vpop.f32.mrb[13].mxu0  ;;  %v648_v22 = vpack.c.bf16 %v2217_v17, %v2213_v15  ;;  %1972 = vmatpush3.bf16.msra.mxu1 %v2147_v45  ;;  %v2154_v45 = vld [vmem:[#allocation2 + $0x100] sm:$0xff]  }
 0x1bf   : > { %v616_v23 = vadd.f32 %v1713_v47, %v615_v21  ;;  %v1904_v24 = vpop.f32.mrb[14].mxu0  ;;  %1973 = vmatprep.subr.bf16.mxu1 %v2148_v46  ;;  %2001 = vmatprep.subr.bf16.mxu0 %v2154_v45 }
 0x1c0   : > { %2226 = vtanh.f32 %v624_v20  ;;  %v627_v25 = vadd.f32 %v1904_v24, %v1713_v47  ;;  %v618_v26 = vpop.f32.mrb[15].mxu0  ;;  %1925 = vmatprep.mubr.bf16.mxu1 %v648_v22 }
 0x1c1   : > { %2228 = vtanh.f32 %v616_v23  ;;  %v619_v27 = vadd.f32 %v1713_v47, %v618_v26  ;;  %1926 = vmatmul.mubr.bf16.gmra.mrb[4].mxu1 %v649_v19  ;;  %v2149_v47 = vld [vmem:[#allocation2 + $0xd8] sm:$0xff]  }
 0x1c2   : > { %v2219_v30 = vpop.eup %2218  ;;  %2230 = vtanh.f32 %v627_v25  ;;  %1974 = vmatpush3.bf16.msra.mxu1 %v2148_v46  ;;  %v2155_v46 = vld [vmem:[#allocation2 + $0x108] sm:$0xff]  }
 0x1c3   : > { %v2221_v31 = vpop.eup %2220  ;;  %2232 = vtanh.f32 %v619_v27  ;;  %1975 = vmatprep.subr.bf16.mxu1 %v2149_v47 }
 0x1c4   : > { %v2223_v32 = vpop.eup %2222 }
 0x1c5   : > { %v2225_v33 = vpop.eup %2224  ;;  %v651_v34 = vpack.c.bf16 %v2223_v32, %v2219_v30 }
 0x1c6   : > { %v650_v35 = vpack.c.bf16 %v2225_v33, %v2221_v31  ;;  %1976 = vmatpush3.bf16.msra.mxu1 %v2149_v47  ;;  %v2156_v47 = vld [vmem:[#allocation2 + $0x110] sm:$0xff]  }
 0x1c7   : > { %1977 = vmatprep.subr.bf16.mxu1 %v2150_v41 }
 0x1c8   : > { %1929 = vmatprep.mubr.bf16.mxu1 %v650_v35 }
 0x1c9   : > { %1930 = vmatmul.mubr.bf16.gmra.mrb[8].mxu1 %v651_v34 }
 0x1ca   : > { %v2227_v28 = vpop.eup %2226  ;;  %1978 = vmatpush3.bf16.msra.mxu1 %v2150_v41 }
 0x1cb   : > { %v2229_v36 = vpop.eup %2228  ;;  %1979 = vmatprep.subr.bf16.mxu1 %v2151_v42 }
 0x1cc   : > { %v2231_v37 = vpop.eup %2230 }
 0x1cd   : > { %v2233_v38 = vpop.eup %2232  ;;  %v653_v39 = vpack.c.bf16 %v2231_v37, %v2227_v28 }
 0x1ce   : > { %v652_v29 = vpack.c.bf16 %v2233_v38, %v2229_v36  ;;  %1980 = vmatpush3.bf16.msra.mxu1 %v2151_v42  ;;  %v2158_v42 = vld [vmem:[#allocation2 + $0x120] sm:$0xff]  }
 0x1cf   : > { %1981 = vmatprep.subr.bf16.mxu1 %v2152_v43 }
 0x1d0   : > { %1933 = vmatprep.mubr.bf16.mxu1 %v652_v29 }
 0x1d1   : > { %1934 = vmatmul.mubr.bf16.gmra.mrb[12].mxu1 %v653_v39 }
 0x1d2   : > { %1982 = vmatpush3.bf16.msra.mxu1 %v2152_v43  ;;  %v2159_v43 = vld [vmem:[#allocation2 + $0x128] sm:$0xff]  }
 0x1d3   : > { %1983 = vmatprep.subr.bf16.mxu1 %v2153_v44 }
 0x1d6   : > { %1984 = vmatpush3.bf16.msra.mxu1 %v2153_v44  ;;  %v2160_v44 = vld [vmem:[#allocation2 + $0x130] sm:$0xff]  }
 0x28c   : > { %v1923_v49 = vpop.f32.mrb[0].mxu1 }
 0x28d   : > { %v770_v50 = vadd.f32 %v1923_v49, %v1723_v48  ;;  %v761_v51 = vpop.f32.mrb[1].mxu1  ;;  %v1733_v49 = vld [vmem:[%s2771_s4 + $0x2] ss:$0 sm:$0xff] }
 0x28e   : > { %v762_v52 = vadd.f32 %v1723_v48, %v761_v51  ;;  %v1924_v53 = vpop.f32.mrb[2].mxu1 }
 0x28f   : > { %2234 = vtanh.f32 %v770_v50  ;;  %v773_v54 = vadd.f32 %v1924_v53, %v1723_v48  ;;  %v764_v55 = vpop.f32.mrb[3].mxu1 }
 0x290   : > { %2236 = vtanh.f32 %v762_v52  ;;  %v765_v56 = vadd.f32 %v1723_v48, %v764_v55 }
 0x291   : > { %2238 = vtanh.f32 %v773_v54 }
 0x292   : > { %2240 = vtanh.f32 %v765_v56 }
 0x294   : > { %v1927_v57 = vpop.f32.mrb[4].mxu1 }
 0x295   : > { %v786_v58 = vadd.f32 %v1927_v57, %v1723_v48  ;;  %v777_v59 = vpop.f32.mrb[5].mxu1 }
 0x296   : > { %v778_v60 = vadd.f32 %v1723_v48, %v777_v59  ;;  %v1928_v61 = vpop.f32.mrb[6].mxu1 }
 0x297   : > { %2242 = vtanh.f32 %v786_v58  ;;  %v789_v62 = vadd.f32 %v1928_v61, %v1723_v48  ;;  %v780_v63 = vpop.f32.mrb[7].mxu1 }
 0x298   : > { %2244 = vtanh.f32 %v778_v60  ;;  %v781_v0 = vadd.f32 %v1723_v48, %v780_v63 }
 0x299   : > { %v2235_v1 = vpop.eup %2234  ;;  %2246 = vtanh.f32 %v789_v62 }
 0x29a   : > { %v2237_v2 = vpop.eup %2236  ;;  %2248 = vtanh.f32 %v781_v0 }
 0x29b   : > { %v2239_v3 = vpop.eup %2238 }
 0x29c   : > { %v2241_v4 = vpop.eup %2240  ;;  %v1931_v5 = vpop.f32.mrb[8].mxu1  ;;  %v841_v6 = vpack.c.bf16 %v2239_v3, %v2235_v1 }
 0x29d   : > { %v802_v7 = vadd.f32 %v1931_v5, %v1723_v48  ;;  %v793_v8 = vpop.f32.mrb[9].mxu1  ;;  %v840_v9 = vpack.c.bf16 %v2241_v4, %v2237_v2 }
 0x29e   : > { %v794_v10 = vadd.f32 %v1723_v48, %v793_v8  ;;  %v1932_v11 = vpop.f32.mrb[10].mxu1 }
 0x29f   : > { %2250 = vtanh.f32 %v802_v7  ;;  %v805_v12 = vadd.f32 %v1932_v11, %v1723_v48  ;;  %v796_v13 = vpop.f32.mrb[11].mxu1  ;;  %1953 = vmatprep.mubr.bf16.mxu0 %v840_v9 }
 0x2a0   : > { %2252 = vtanh.f32 %v794_v10  ;;  %v797_v14 = vadd.f32 %v1723_v48, %v796_v13  ;;  %1954 = vmatmul.mubr.bf16.vlgmr.msra.gmra.mrb[16].mxu0 %v841_v6 }
 0x2a1   : > { %v2243_v15 = vpop.eup %2242  ;;  %2254 = vtanh.f32 %v805_v12  ;;  %2002 = vmatpush3.bf16.msra.mxu0 %v2154_v45  ;;  %v2161_v45 = vld [vmem:[#allocation2 + $0x138] sm:$0xff]  }
 0x2a2   : > { %v2245_v16 = vpop.eup %2244  ;;  %2256 = vtanh.f32 %v797_v14  ;;  %2003 = vmatprep.subr.bf16.mxu0 %v2155_v46 }
 0x2a3   : > { %v2247_v17 = vpop.eup %2246 }
 0x2a4   : > { %v2249_v18 = vpop.eup %2248  ;;  %v1935_v19 = vpop.f32.mrb[12].mxu1  ;;  %v843_v20 = vpack.c.bf16 %v2247_v17, %v2243_v15 }
 0x2a5   : > { %v818_v21 = vadd.f32 %v1935_v19, %v1723_v48  ;;  %v809_v22 = vpop.f32.mrb[13].mxu1  ;;  %v842_v23 = vpack.c.bf16 %v2249_v18, %v2245_v16  ;;  %2004 = vmatpush3.bf16.msra.mxu0 %v2155_v46  ;;  %v2162_v46 = vld [vmem:[%s2772_s5] sm:$0xff]  }
 0x2a6   : > { %v810_v24 = vadd.f32 %v1723_v48, %v809_v22  ;;  %v1936_v25 = vpop.f32.mrb[14].mxu1  ;;  %2005 = vmatprep.subr.bf16.mxu0 %v2156_v47  ;;  %2033 = vmatprep.subr.bf16.mxu1 %v2162_v46 }
 0x2a7   : > { %2258 = vtanh.f32 %v818_v21  ;;  %v821_v26 = vadd.f32 %v1936_v25, %v1723_v48  ;;  %v812_v27 = vpop.f32.mrb[15].mxu1  ;;  %1957 = vmatprep.mubr.bf16.mxu0 %v842_v23 }
 0x2a8   : > { %2260 = vtanh.f32 %v810_v24  ;;  %v813_v30 = vadd.f32 %v1723_v48, %v812_v27  ;;  %1958 = vmatmul.mubr.bf16.gmra.mrb[20].mxu0 %v843_v20  ;;  %v2157_v48 = vld [vmem:[#allocation2 + $0x118] sm:$0xff]  }
 0x2a9   : > { %v2251_v31 = vpop.eup %2250  ;;  %2262 = vtanh.f32 %v821_v26  ;;  %2006 = vmatpush3.bf16.msra.mxu0 %v2156_v47  ;;  %v2163_v47 = vld [vmem:[%s2772_s5 + $0x8] sm:$0xff]  }
 0x2aa   : > { %v2253_v32 = vpop.eup %2252  ;;  %2264 = vtanh.f32 %v813_v30  ;;  %2007 = vmatprep.subr.bf16.mxu0 %v2157_v48 }
 0x2ab   : > { %v2255_v33 = vpop.eup %2254 }
 0x2ac   : > { %v2257_v34 = vpop.eup %2256  ;;  %v845_v35 = vpack.c.bf16 %v2255_v33, %v2251_v31 }
 0x2ad   : > { %v844_v28 = vpack.c.bf16 %v2257_v34, %v2253_v32  ;;  %2008 = vmatpush3.bf16.msra.mxu0 %v2157_v48  ;;  %v2164_v48 = vld [vmem:[%s2772_s5 + $0x10] sm:$0xff]  }
 0x2ae   : > { %2009 = vmatprep.subr.bf16.mxu0 %v2158_v42 }
 0x2af   : > { %1961 = vmatprep.mubr.bf16.mxu0 %v844_v28 }
 0x2b0   : > { %1962 = vmatmul.mubr.bf16.gmra.mrb[24].mxu0 %v845_v35 }
 0x2b1   : > { %v2259_v36 = vpop.eup %2258  ;;  %2010 = vmatpush3.bf16.msra.mxu0 %v2158_v42 }
 0x2b2   : > { %v2261_v37 = vpop.eup %2260  ;;  %2011 = vmatprep.subr.bf16.mxu0 %v2159_v43 }
 0x2b3   : > { %v2263_v38 = vpop.eup %2262 }
 0x2b4   : > { %v2265_v39 = vpop.eup %2264  ;;  %v847_v29 = vpack.c.bf16 %v2263_v38, %v2259_v36 }
 0x2b5   : > { %v846_v40 = vpack.c.bf16 %v2265_v39, %v2261_v37  ;;  %2012 = vmatpush3.bf16.msra.mxu0 %v2159_v43  ;;  %v2166_v43 = vld [vmem:[%s2772_s5 + $0x20] sm:$0xff]  }
 0x2b6   : > { %2013 = vmatprep.subr.bf16.mxu0 %v2160_v44 }
 0x2b7   : > { %1965 = vmatprep.mubr.bf16.mxu0 %v846_v40 }
 0x2b8   : > { %1966 = vmatmul.mubr.bf16.gmra.mrb[28].mxu0 %v847_v29 }
 0x2b9   : > { %2014 = vmatpush3.bf16.msra.mxu0 %v2160_v44  ;;  %v2167_v44 = vld [vmem:[%s2772_s5 + $0x28] sm:$0xff]  }
 0x2ba   : > { %2015 = vmatprep.subr.bf16.mxu0 %v2161_v45 }
 0x2bd   : > { %2016 = vmatpush3.bf16.msra.mxu0 %v2161_v45  ;;  %v2168_v45 = vld [vmem:[%s2772_s5 + $0x30] sm:$0xff]  }
 0x373   : > { %v1955_v50 = vpop.f32.mrb[16].mxu0 }
 0x374   : > { %v964_v51 = vadd.f32 %v1955_v50, %v1733_v49  ;;  %v955_v52 = vpop.f32.mrb[17].mxu0  ;;  %v1743_v50 = vld [vmem:[%s2771_s4 + $0x3] ss:$0 sm:$0xff] }
 0x375   : > { %v956_v53 = vadd.f32 %v1733_v49, %v955_v52  ;;  %v1956_v54 = vpop.f32.mrb[18].mxu0 }
 0x376   : > { %2266 = vtanh.f32 %v964_v51  ;;  %v967_v55 = vadd.f32 %v1956_v54, %v1733_v49  ;;  %v958_v56 = vpop.f32.mrb[19].mxu0 }
 0x377   : > { %2268 = vtanh.f32 %v956_v53  ;;  %v959_v57 = vadd.f32 %v1733_v49, %v958_v56 }
 0x378   : > { %2270 = vtanh.f32 %v967_v55 }
 0x379   : > { %2272 = vtanh.f32 %v959_v57 }
 0x37b   : > { %v1959_v58 = vpop.f32.mrb[20].mxu0 }
 0x37c   : > { %v980_v59 = vadd.f32 %v1959_v58, %v1733_v49  ;;  %v971_v60 = vpop.f32.mrb[21].mxu0 }
 0x37d   : > { %v972_v61 = vadd.f32 %v1733_v49, %v971_v60  ;;  %v1960_v62 = vpop.f32.mrb[22].mxu0 }
 0x37e   : > { %2274 = vtanh.f32 %v980_v59  ;;  %v983_v63 = vadd.f32 %v1960_v62, %v1733_v49  ;;  %v974_v0 = vpop.f32.mrb[23].mxu0 }
 0x37f   : > { %2276 = vtanh.f32 %v972_v61  ;;  %v975_v1 = vadd.f32 %v1733_v49, %v974_v0 }
 0x380   : > { %v2267_v2 = vpop.eup %2266  ;;  %2278 = vtanh.f32 %v983_v63 }
 0x381   : > { %v2269_v3 = vpop.eup %2268  ;;  %2280 = vtanh.f32 %v975_v1 }
 0x382   : > { %v2271_v4 = vpop.eup %2270 }
 0x383   : > { %v2273_v5 = vpop.eup %2272  ;;  %v1963_v6 = vpop.f32.mrb[24].mxu0  ;;  %v1035_v7 = vpack.c.bf16 %v2271_v4, %v2267_v2 }
 0x384   : > { %v996_v8 = vadd.f32 %v1963_v6, %v1733_v49  ;;  %v987_v9 = vpop.f32.mrb[25].mxu0  ;;  %v1034_v10 = vpack.c.bf16 %v2273_v5, %v2269_v3 }
 0x385   : > { %v988_v11 = vadd.f32 %v1733_v49, %v987_v9  ;;  %v1964_v12 = vpop.f32.mrb[26].mxu0 }
 0x386   : > { %2282 = vtanh.f32 %v996_v8  ;;  %v999_v13 = vadd.f32 %v1964_v12, %v1733_v49  ;;  %v990_v14 = vpop.f32.mrb[27].mxu0  ;;  %1985 = vmatprep.mubr.bf16.mxu1 %v1034_v10 }
 0x387   : > { %2284 = vtanh.f32 %v988_v11  ;;  %v991_v15 = vadd.f32 %v1733_v49, %v990_v14  ;;  %1986 = vmatmul.mubr.bf16.vlgmr.msra.gmra.mrb[16].mxu1 %v1035_v7 }
 0x388   : > { %v2275_v16 = vpop.eup %2274  ;;  %2286 = vtanh.f32 %v999_v13  ;;  %2034 = vmatpush3.bf16.msra.mxu1 %v2162_v46  ;;  %v2169_v46 = vld [vmem:[%s2772_s5 + $0x38] sm:$0xff]  }
 0x389   : > { %v2277_v17 = vpop.eup %2276  ;;  %2288 = vtanh.f32 %v991_v15  ;;  %2035 = vmatprep.subr.bf16.mxu1 %v2163_v47 }
 0x38a   : > { %v2279_v18 = vpop.eup %2278 }
 0x38b   : > { %v2281_v19 = vpop.eup %2280  ;;  %v1967_v20 = vpop.f32.mrb[28].mxu0  ;;  %v1037_v21 = vpack.c.bf16 %v2279_v18, %v2275_v16 }
 0x38c   : > { %v1012_v22 = vadd.f32 %v1967_v20, %v1733_v49  ;;  %v1003_v23 = vpop.f32.mrb[29].mxu0  ;;  %v1036_v24 = vpack.c.bf16 %v2281_v19, %v2277_v17  ;;  %2036 = vmatpush3.bf16.msra.mxu1 %v2163_v47  ;;  %v1753_v47 = vld [vmem:[%s2771_s4 + $0x4] ss:$0 sm:$0xff] }
 0x38d   : > { %v1004_v25 = vadd.f32 %v1733_v49, %v1003_v23  ;;  %v1968_v26 = vpop.f32.mrb[30].mxu0  ;;  %2037 = vmatprep.subr.bf16.mxu1 %v2164_v48 }
 0x38e   : > { %2290 = vtanh.f32 %v1012_v22  ;;  %v1015_v27 = vadd.f32 %v1968_v26, %v1733_v49  ;;  %v1006_v30 = vpop.f32.mrb[31].mxu0  ;;  %1989 = vmatprep.mubr.bf16.mxu1 %v1036_v24 }
 0x38f   : > { %2292 = vtanh.f32 %v1004_v25  ;;  %v1007_v31 = vadd.f32 %v1733_v49, %v1006_v30  ;;  %1990 = vmatmul.mubr.bf16.gmra.mrb[20].mxu1 %v1037_v21  ;;  %v2165_v49 = vld [vmem:[%s2772_s5 + $0x18] sm:$0xff]  }
 0x390   : > { %v2283_v32 = vpop.eup %2282  ;;  %2294 = vtanh.f32 %v1015_v27  ;;  %2038 = vmatpush3.bf16.msra.mxu1 %v2164_v48 }
 0x391   : > { %v2285_v33 = vpop.eup %2284  ;;  %2296 = vtanh.f32 %v1007_v31  ;;  %2039 = vmatprep.subr.bf16.mxu1 %v2165_v49 }
 0x392   : > { %v2287_v34 = vpop.eup %2286 }
 0x393   : > { %v2289_v35 = vpop.eup %2288  ;;  %v1039_v28 = vpack.c.bf16 %v2287_v34, %v2283_v32 }
 0x394   : > { %v1038_v36 = vpack.c.bf16 %v2289_v35, %v2285_v33  ;;  %2040 = vmatpush3.bf16.msra.mxu1 %v2165_v49 }
 0x395   : > { %2041 = vmatprep.subr.bf16.mxu1 %v2166_v43 }
 0x396   : > { %1993 = vmatprep.mubr.bf16.mxu1 %v1038_v36 }
 0x397   : > { %1994 = vmatmul.mubr.bf16.gmra.mrb[24].mxu1 %v1039_v28 }
 0x398   : > { %v2291_v37 = vpop.eup %2290  ;;  %2042 = vmatpush3.bf16.msra.mxu1 %v2166_v43 }
 0x399   : > { %v2293_v38 = vpop.eup %2292  ;;  %2043 = vmatprep.subr.bf16.mxu1 %v2167_v44 }
 0x39a   : > { %v2295_v39 = vpop.eup %2294 }
 0x39b   : > { %v2297_v29 = vpop.eup %2296  ;;  %v1041_v40 = vpack.c.bf16 %v2295_v39, %v2291_v37 }
 0x39c   : > { %v1040_v41 = vpack.c.bf16 %v2297_v29, %v2293_v38  ;;  %2044 = vmatpush3.bf16.msra.mxu1 %v2167_v44 }
 0x39d   : > { %2045 = vmatprep.subr.bf16.mxu1 %v2168_v45 }
 0x39e   : > { %1997 = vmatprep.mubr.bf16.mxu1 %v1040_v41 }
 0x39f   : > { %1998 = vmatmul.mubr.bf16.gmra.mrb[28].mxu1 %v1041_v40 }
 0x3a0   : > { %2046 = vmatpush3.bf16.msra.mxu1 %v2168_v45 }
 0x3a1   : > { %2047 = vmatprep.subr.bf16.mxu1 %v2169_v46 }
 0x3a4   : > { %2048 = vmatpush3.bf16.msra.mxu1 %v2169_v46 }
 0x45a   : > { %v1987_v51 = vpop.f32.mrb[16].mxu1 }
 0x45b   : > { %v1158_v52 = vadd.f32 %v1987_v51, %v1743_v50  ;;  %v1149_v53 = vpop.f32.mrb[17].mxu1 }
 0x45c   : > { %v1150_v54 = vadd.f32 %v1743_v50, %v1149_v53  ;;  %v1988_v55 = vpop.f32.mrb[18].mxu1 }
 0x45d   : > { %2298 = vtanh.f32 %v1158_v52  ;;  %v1161_v56 = vadd.f32 %v1988_v55, %v1743_v50  ;;  %v1152_v57 = vpop.f32.mrb[19].mxu1 }
 0x45e   : > { %2300 = vtanh.f32 %v1150_v54  ;;  %v1153_v58 = vadd.f32 %v1743_v50, %v1152_v57 }
 0x45f   : > { %2302 = vtanh.f32 %v1161_v56 }
 0x460   : > { %2304 = vtanh.f32 %v1153_v58 }
 0x462   : > { %v1991_v59 = vpop.f32.mrb[20].mxu1 }
 0x463   : > { %v1174_v60 = vadd.f32 %v1991_v59, %v1743_v50  ;;  %v1165_v61 = vpop.f32.mrb[21].mxu1 }
 0x464   : > { %v1166_v62 = vadd.f32 %v1743_v50, %v1165_v61  ;;  %v1992_v63 = vpop.f32.mrb[22].mxu1 }
 0x465   : > { %2306 = vtanh.f32 %v1174_v60  ;;  %v1177_v0 = vadd.f32 %v1992_v63, %v1743_v50  ;;  %v1168_v1 = vpop.f32.mrb[23].mxu1 }
 0x466   : > { %2308 = vtanh.f32 %v1166_v62  ;;  %v1169_v2 = vadd.f32 %v1743_v50, %v1168_v1 }
 0x467   : > { %v2299_v3 = vpop.eup %2298  ;;  %2310 = vtanh.f32 %v1177_v0 }
 0x468   : > { %v2301_v4 = vpop.eup %2300  ;;  %2312 = vtanh.f32 %v1169_v2 }
 0x469   : > { %v2303_v5 = vpop.eup %2302 }
 0x46a   : > { %v2305_v6 = vpop.eup %2304  ;;  %v1995_v7 = vpop.f32.mrb[24].mxu1  ;;  %v1229_v8 = vpack.c.bf16 %v2303_v5, %v2299_v3 }
 0x46b   : > { %v1190_v9 = vadd.f32 %v1995_v7, %v1743_v50  ;;  %v1181_v10 = vpop.f32.mrb[25].mxu1  ;;  %v1228_v11 = vpack.c.bf16 %v2305_v6, %v2301_v4 }
 0x46c   : > { %v1182_v12 = vadd.f32 %v1743_v50, %v1181_v10  ;;  %v1996_v13 = vpop.f32.mrb[26].mxu1 }
 0x46d   : > { %2314 = vtanh.f32 %v1190_v9  ;;  %v1193_v14 = vadd.f32 %v1996_v13, %v1743_v50  ;;  %v1184_v15 = vpop.f32.mrb[27].mxu1  ;;  %2017 = vmatprep.mubr.bf16.mxu0 %v1228_v11 }
 0x46e   : > { %2316 = vtanh.f32 %v1182_v12  ;;  %v1185_v16 = vadd.f32 %v1743_v50, %v1184_v15  ;;  %2018 = vmatmul.mubr.bf16.vlgmr.msra.gmra.mrb[32].mxu0 %v1229_v8 }
 0x46f   : > { %v2307_v17 = vpop.eup %2306  ;;  %2318 = vtanh.f32 %v1193_v14 }
 0x470   : > { %v2309_v18 = vpop.eup %2308  ;;  %2320 = vtanh.f32 %v1185_v16 }
 0x471   : > { %v2311_v19 = vpop.eup %2310 }
 0x472   : > { %v2313_v20 = vpop.eup %2312  ;;  %v1999_v21 = vpop.f32.mrb[28].mxu1  ;;  %v1231_v22 = vpack.c.bf16 %v2311_v19, %v2307_v17 }
 0x473   : > { %v1206_v23 = vadd.f32 %v1999_v21, %v1743_v50  ;;  %v1197_v24 = vpop.f32.mrb[29].mxu1  ;;  %v1230_v25 = vpack.c.bf16 %v2313_v20, %v2309_v18 }
 0x474   : > { %v1198_v26 = vadd.f32 %v1743_v50, %v1197_v24  ;;  %v2000_v27 = vpop.f32.mrb[30].mxu1 }
 0x475   : > { %2322 = vtanh.f32 %v1206_v23  ;;  %v1209_v30 = vadd.f32 %v2000_v27, %v1743_v50  ;;  %v1200_v31 = vpop.f32.mrb[31].mxu1  ;;  %2021 = vmatprep.mubr.bf16.mxu0 %v1230_v25 }
 0x476   : > { %2324 = vtanh.f32 %v1198_v26  ;;  %v1201_v32 = vadd.f32 %v1743_v50, %v1200_v31  ;;  %2022 = vmatmul.mubr.bf16.gmra.mrb[36].mxu0 %v1231_v22 }
 0x477   : > { %v2315_v33 = vpop.eup %2314  ;;  %2326 = vtanh.f32 %v1209_v30 }
 0x478   : > { %v2317_v34 = vpop.eup %2316  ;;  %2328 = vtanh.f32 %v1201_v32 }
 0x479   : > { %v2319_v35 = vpop.eup %2318 }
 0x47a   : > { %v2321_v28 = vpop.eup %2320  ;;  %v1233_v36 = vpack.c.bf16 %v2319_v35, %v2315_v33 }
 0x47b   : > { %v1232_v37 = vpack.c.bf16 %v2321_v28, %v2317_v34 }
 0x47d   : > { %2025 = vmatprep.mubr.bf16.mxu0 %v1232_v37 }
 0x47e   : > { %2026 = vmatmul.mubr.bf16.gmra.mrb[40].mxu0 %v1233_v36 }
 0x47f   : > { %v2323_v38 = vpop.eup %2322 }
 0x480   : > { %v2325_v39 = vpop.eup %2324 }
 0x481   : > { %v2327_v29 = vpop.eup %2326 }
 0x482   : > { %v2329_v40 = vpop.eup %2328  ;;  %v1235_v41 = vpack.c.bf16 %v2327_v29, %v2323_v38 }
 0x483   : > { %v1234_v42 = vpack.c.bf16 %v2329_v40, %v2325_v39  ;;  %v1762_v40 = vld [vmem:[%s2773_s6] ss:$0 sm:$0xff] }
 0x485   : > { %2029 = vmatprep.mubr.bf16.mxu0 %v1234_v42 }
 0x486   : > { %2030 = vmatmul.mubr.bf16.gmra.mrb[44].mxu0 %v1235_v41 }
 0x541   : > { %v2019_v48 = vpop.f32.mrb[32].mxu0 }
 0x542   : > { %v1352_v49 = vadd.f32 %v2019_v48, %v1753_v47  ;;  %v1343_v50 = vpop.f32.mrb[33].mxu0 }
 0x543   : > { %v1344_v51 = vadd.f32 %v1753_v47, %v1343_v50  ;;  %v2020_v52 = vpop.f32.mrb[34].mxu0 }
 0x544   : > { %2330 = vtanh.f32 %v1352_v49  ;;  %v1355_v53 = vadd.f32 %v2020_v52, %v1753_v47  ;;  %v1346_v54 = vpop.f32.mrb[35].mxu0 }
 0x545   : > { %2332 = vtanh.f32 %v1344_v51  ;;  %v1347_v55 = vadd.f32 %v1753_v47, %v1346_v54 }
 0x546   : > { %2334 = vtanh.f32 %v1355_v53 }
 0x547   : > { %2336 = vtanh.f32 %v1347_v55 }
 0x549   : > { %v2023_v56 = vpop.f32.mrb[36].mxu0 }
 0x54a   : > { %v1368_v57 = vadd.f32 %v2023_v56, %v1753_v47  ;;  %v1359_v58 = vpop.f32.mrb[37].mxu0 }
 0x54b   : > { %v1360_v59 = vadd.f32 %v1753_v47, %v1359_v58  ;;  %v2024_v60 = vpop.f32.mrb[38].mxu0 }
 0x54c   : > { %2338 = vtanh.f32 %v1368_v57  ;;  %v1371_v61 = vadd.f32 %v2024_v60, %v1753_v47  ;;  %v1362_v62 = vpop.f32.mrb[39].mxu0 }
 0x54d   : > { %2340 = vtanh.f32 %v1360_v59  ;;  %v1363_v63 = vadd.f32 %v1753_v47, %v1362_v62 }
 0x54e   : > { %v2331_v0 = vpop.eup %2330  ;;  %2342 = vtanh.f32 %v1371_v61 }
 0x54f   : > { %v2333_v1 = vpop.eup %2332  ;;  %2344 = vtanh.f32 %v1363_v63 }
 0x550   : > { %v2335_v2 = vpop.eup %2334 }
 0x551   : > { %v2337_v3 = vpop.eup %2336  ;;  %v2027_v4 = vpop.f32.mrb[40].mxu0  ;;  %v1423_v5 = vpack.c.bf16 %v2335_v2, %v2331_v0 }
 0x552   : > { %v1384_v6 = vadd.f32 %v2027_v4, %v1753_v47  ;;  %v1375_v7 = vpop.f32.mrb[41].mxu0  ;;  %v1422_v8 = vpack.c.bf16 %v2337_v3, %v2333_v1 }
 0x553   : > { %v1376_v9 = vadd.f32 %v1753_v47, %v1375_v7  ;;  %v2028_v10 = vpop.f32.mrb[42].mxu0 }
 0x554   : > { %2346 = vtanh.f32 %v1384_v6  ;;  %v1387_v11 = vadd.f32 %v2028_v10, %v1753_v47  ;;  %v1378_v12 = vpop.f32.mrb[43].mxu0  ;;  %2049 = vmatprep.mubr.bf16.mxu1 %v1422_v8 }
 0x555   : > { %2348 = vtanh.f32 %v1376_v9  ;;  %v1379_v13 = vadd.f32 %v1753_v47, %v1378_v12  ;;  %2050 = vmatmul.mubr.bf16.vlgmr.msra.gmra.mrb[32].mxu1 %v1423_v5 }
 0x556   : > { %v2339_v14 = vpop.eup %2338  ;;  %2350 = vtanh.f32 %v1387_v11 }
 0x557   : > { %v2341_v15 = vpop.eup %2340  ;;  %2352 = vtanh.f32 %v1379_v13 }
 0x558   : > { %v2343_v16 = vpop.eup %2342 }
 0x559   : > { %v2345_v17 = vpop.eup %2344  ;;  %v2031_v18 = vpop.f32.mrb[44].mxu0  ;;  %v1425_v19 = vpack.c.bf16 %v2343_v16, %v2339_v14 }
 0x55a   : > { %v1400_v20 = vadd.f32 %v2031_v18, %v1753_v47  ;;  %v1391_v21 = vpop.f32.mrb[45].mxu0  ;;  %v1424_v22 = vpack.c.bf16 %v2345_v17, %v2341_v15 }
 0x55b   : > { %v1392_v23 = vadd.f32 %v1753_v47, %v1391_v21  ;;  %v2032_v24 = vpop.f32.mrb[46].mxu0 }
 0x55c   : > { %2354 = vtanh.f32 %v1400_v20  ;;  %v1403_v25 = vadd.f32 %v2032_v24, %v1753_v47  ;;  %v1394_v26 = vpop.f32.mrb[47].mxu0  ;;  %2053 = vmatprep.mubr.bf16.mxu1 %v1424_v22 }
 0x55d   : > { %2356 = vtanh.f32 %v1392_v23  ;;  %v1395_v27 = vadd.f32 %v1753_v47, %v1394_v26  ;;  %2054 = vmatmul.mubr.bf16.gmra.mrb[36].mxu1 %v1425_v19 }
 0x55e   : > { %v2347_v30 = vpop.eup %2346  ;;  %2358 = vtanh.f32 %v1403_v25 }
 0x55f   : > { %v2349_v31 = vpop.eup %2348  ;;  %2360 = vtanh.f32 %v1395_v27 }
 0x560   : > { %v2351_v32 = vpop.eup %2350 }
 0x561   : > { %v2353_v33 = vpop.eup %2352  ;;  %v1427_v34 = vpack.c.bf16 %v2351_v32, %v2347_v30 }
 0x562   : > { %v1426_v35 = vpack.c.bf16 %v2353_v33, %v2349_v31 }
 0x564   : > { %2057 = vmatprep.mubr.bf16.mxu1 %v1426_v35 }
 0x565   : > { %2058 = vmatmul.mubr.bf16.gmra.mrb[40].mxu1 %v1427_v34 }
 0x566   : > { %v2355_v28 = vpop.eup %2354 }
 0x567   : > { %v2357_v36 = vpop.eup %2356 }
 0x568   : > { %v2359_v37 = vpop.eup %2358 }
 0x569   : > { %v2361_v38 = vpop.eup %2360  ;;  %v1429_v39 = vpack.c.bf16 %v2359_v37, %v2355_v28 }
 0x56a   : > { %v1428_v29 = vpack.c.bf16 %v2361_v38, %v2357_v36 }
 0x56c   : > { %2061 = vmatprep.mubr.bf16.mxu1 %v1428_v29 }
 0x56d   : > { %2062 = vmatmul.mubr.bf16.gmra.mrb[44].mxu1 %v1429_v39 }
 0x628   : > { %v2051_v41 = vpop.f32.mrb[32].mxu1 }
 0x629   : > { %v1544_v42 = vadd.f32 %v2051_v41, %v1762_v40  ;;  %v1535_v43 = vpop.f32.mrb[33].mxu1 }
 0x62a   : > { %v1536_v44 = vadd.f32 %v1762_v40, %v1535_v43  ;;  %v2052_v45 = vpop.f32.mrb[34].mxu1 }
 0x62b   : > { %1600 = vst [vmem:[%s2697_s9 + $0x10] sm:$0xff] %v1544_v42  ;;  %v1547_v46 = vadd.f32 %v2052_v45, %v1762_v40  ;;  %v1538_v47 = vpop.f32.mrb[35].mxu1 }
 0x62c   : > { %1598 = vst [vmem:[%s2697_s9] sm:$0xff] %v1536_v44  ;;  %v1539_v48 = vadd.f32 %v1762_v40, %v1538_v47 }
 0x62d   : > { %1601 = vst [vmem:[%s2697_s9 + $0x18] sm:$0xff] %v1547_v46 }
 0x62e   : > { %1599 = vst [vmem:[%s2697_s9 + $0x8] sm:$0xff] %v1539_v48 }
 0x630   : > { %v2055_v49 = vpop.f32.mrb[36].mxu1 }
 0x631   : > { %v1560_v50 = vadd.f32 %v2055_v49, %v1762_v40  ;;  %v1551_v51 = vpop.f32.mrb[37].mxu1 }
 0x632   : > { %v1552_v52 = vadd.f32 %v1762_v40, %v1551_v51  ;;  %v2056_v53 = vpop.f32.mrb[38].mxu1 }
 0x633   : > { %1604 = vst [vmem:[%s2697_s9 + $0x30] sm:$0xff] %v1560_v50  ;;  %v1563_v54 = vadd.f32 %v2056_v53, %v1762_v40  ;;  %v1554_v55 = vpop.f32.mrb[39].mxu1 }
 0x634   : > { %1602 = vst [vmem:[%s2697_s9 + $0x20] sm:$0xff] %v1552_v52  ;;  %v1555_v56 = vadd.f32 %v1762_v40, %v1554_v55 }
 0x635   : > { %1605 = vst [vmem:[%s2697_s9 + $0x38] sm:$0xff] %v1563_v54 }
 0x636   : > { %1603 = vst [vmem:[%s2697_s9 + $0x28] sm:$0xff] %v1555_v56 }
 0x638   : > { %v2059_v57 = vpop.f32.mrb[40].mxu1 }
 0x639   : > { %v1576_v58 = vadd.f32 %v2059_v57, %v1762_v40  ;;  %v1567_v59 = vpop.f32.mrb[41].mxu1 }
 0x63a   : > { %v1568_v60 = vadd.f32 %v1762_v40, %v1567_v59  ;;  %v2060_v61 = vpop.f32.mrb[42].mxu1 }
 0x63b   : > { %1608 = vst [vmem:[%s2697_s9 + $0x50] sm:$0xff] %v1576_v58  ;;  %v1579_v62 = vadd.f32 %v2060_v61, %v1762_v40  ;;  %v1570_v63 = vpop.f32.mrb[43].mxu1 }
 0x63c   : > { %1606 = vst [vmem:[%s2697_s9 + $0x40] sm:$0xff] %v1568_v60  ;;  %v1571_v0 = vadd.f32 %v1762_v40, %v1570_v63 }
 0x63d   : > { %1609 = vst [vmem:[%s2697_s9 + $0x58] sm:$0xff] %v1579_v62 }
 0x63e   : > { %1607 = vst [vmem:[%s2697_s9 + $0x48] sm:$0xff] %v1571_v0 }
 0x640   : > { %v2063_v1 = vpop.f32.mrb[44].mxu1 }
 0x641   : > { %v1592_v2 = vadd.f32 %v2063_v1, %v1762_v40  ;;  %v1583_v3 = vpop.f32.mrb[45].mxu1 }
 0x642   : > { %v1584_v4 = vadd.f32 %v1762_v40, %v1583_v3  ;;  %v2064_v5 = vpop.f32.mrb[46].mxu1 }
 0x643   : > { %1612 = vst [vmem:[%s2697_s9 + $0x70] sm:$0xff] %v1592_v2  ;;  %v1595_v6 = vadd.f32 %v2064_v5, %v1762_v40  ;;  %v1586_v7 = vpop.f32.mrb[47].mxu1 }
 0x644   : > { %1610 = vst [vmem:[%s2697_s9 + $0x60] sm:$0xff] %v1584_v4  ;;  %v1587_v8 = vadd.f32 %v1762_v40, %v1586_v7 }
 0x645   : > { %1613 = vst [vmem:[%s2697_s9 + $0x78] sm:$0xff] %v1595_v6 }
 0x646   : > { %1611 = vst [vmem:[%s2697_s9 + $0x68] sm:$0xff] %v1587_v8 }
 0x647   : > { %2403 = shalt.err (!%p2400_p7)
}
 0x648   : > { %s2404_s22 = scalar_lea.hbm %s2717_s19, 2048  ;;  %s2408_s8 = scalar_lea.hbm %s2774_s7, 4096 }
 0x649   : > { %p2405_p8 = scmp.ne.s32.totalorder %s2717_s19, %s2404_s22  ;;  %p2409_p1 = scmp.lt.u32.totalorder %s2717_s19, %s2774_s7 }
 0x64a   : > { %p2410_p0 = scmp.lt.u32.totalorder %s2408_s8, %s2404_s22  ;;  %p2412_p6 = scmp.lt.u32.totalorder %s2404_s22, %s2717_s19 }
 0x64b   : > { %p2406_p11 = pnand %p2405_p8, %p2785_p9 }
 0x64c   : > { %p2411_p5 = por %p2410_p0, %p2409_p1 }
 0x64d   : > { %p2407_p13 = pneg %p2406_p11 }
 0x64e   : > { %p2413_p10 = por %p2412_p6, %p2411_p5 }
 0x650   : > { %p2414_p12 = pnand %p2413_p10, %p2407_p13 }
 0x652   : > { %2417 = shalt.err (!%p2414_p12)
}
 0x653   : > { %s2463_s18 = smov 128   ;;  %s2464_s16 = smov 8  }
 0x654   : > { %2069 = dma.vmem_to_hbm [thread:$0]  (%p2785_p9), %s2719_s17, 2048, %s2717_s19, %s2726_s28, %s2463_s18, %s2463_s18, %s2464_s16  }
 0x655 PF: > { %p2081_p2 = scmp.ge.s32.totalorder %s2456_s27, 2  ;;  %s1643_s20 = sand.u32 1, %s2444_s24  }
 0x656   : > { %p2786_p3 = scmp.ne.s32.totalorder %s2779_s12, 0  ;;  %s1644_s15 = scalar_lea.sflag [#allocation4], %s1643_s20 }
 0x658   : > { %p2076_p4 = pnand %p2081_p2, %p2786_p3 }
 0x65a   : > { %2439 = dma.done.wait (!%p2076_p4), %s1644_s15, 2048  }
 0x65b   : > { %2441 = vsyncadd (!%p2076_p4), %s1644_s15, 4294965248  ;;  %p18_p7 = scmp.ge.s32.totalorder %s2530_s30, 4   ;;  %s2787_s24 = smov %s2448_s25 }
 0x65c   : > { %s2788_s25 = smov %s2452_s26  ;;  %s2789_s26 = smov %s2541_s10 }
 0x65d   : > { %s2790_s27 = smov %s2530_s30  ;;  %20 = sbr.rel (!%p18_p7) target bundleno = 4 (0x4), region = 96 }
 0x664   :  { %1649 = vsyncpa [#allocation3], 1 }
 0x665   :  { %1651 = vsyncpa [#allocation3 + $0x1], 1 }
 0x666   :  { %1652 = vsyncpa [#allocation4], 1 }
 0x667   :  { %1654 = vsyncpa [#allocation4 + $0x1], 1 }

</bundles_post_ra>
